<compile_context>
chip_gen: v7x
topology: tpu7x:2x2x1
jax: 0.10.0
libtpu: 0.0.40
codegen_flags: <defaults>
</compile_context>

<pallas_src>
import math

import jax
import jax.numpy as jnp
from jax.experimental import pallas as pl
from jax.experimental.pallas import tpu as pltpu


# ---------------------------------------------------------------------------
# Pallas kernel: one semantic-GCN layer for Gb padded graphs per grid step.
# Refs:
#   s_ref  : [Gb, N_pad, input_dim]   f32   (padded rows zero)
#   a_ref  : [Gb, N_pad, N_pad]       f32   (padded rows/cols zero)
#   w1_ref : [input_dim, hidden_dim]  bf16  (VMEM-resident across grid steps)
#   w2_ref : [hidden_dim, output_dim] bf16  (VMEM-resident across grid steps)
#   out_ref: [Gb, N_pad, output_dim]  f32
# ---------------------------------------------------------------------------
def _semantic_gcn_kernel(s_ref, a_ref, w1_ref, w2_ref, out_ref):
    gb, n_pad, in_dim = s_ref.shape
    hid = w1_ref.shape[1]
    out_dim = w2_ref.shape[1]

    a = a_ref[...]                                         # [Gb, N, N] f32

    # Degree / clamp / rsqrt (f32 VPU).  Padded rows: degree 0 -> 1 -> scale 1,
    # but their A rows are all-zero, so padded outputs are exactly 0 after ReLU.
    deg = jnp.sum(a, axis=-1, keepdims=True)               # [Gb, N, 1]
    d_inv_sqrt = jax.lax.rsqrt(jnp.maximum(deg, 1.0))      # [Gb, N, 1]

    # Normalize adjacency ONCE per graph and reuse for both layers:
    #   A_norm = D^(-1/2) A D^(-1/2)
    a_norm = (d_inv_sqrt * a * jnp.swapaxes(d_inv_sqrt, -1, -2)).astype(jnp.bfloat16)

    w1 = w1_ref[...]                                       # bf16
    w2 = w2_ref[...]                                       # bf16

    # --- layer 1: ReLU( A_norm (S W1) ) -------------------------------------
    # Collapse (Gb, N) -> Gb*N rows so the shared-weight matmul gets a tall M.
    s2d = s_ref[...].reshape(gb * n_pad, in_dim).astype(jnp.bfloat16)
    h1 = jnp.dot(s2d, w1, preferred_element_type=jnp.float32)       # [Gb*N, hid]
    h1 = h1.reshape(gb, n_pad, hid).astype(jnp.bfloat16)
    h1 = jnp.einsum('gij,gjd->gid', a_norm, h1,
                    preferred_element_type=jnp.float32)             # [Gb, N, hid]
    h1 = jnp.maximum(h1, 0.0)                                       # ReLU (f32)

    # --- layer 2: ReLU( A_norm (H1 W2) ) ------------------------------------
    h1_2d = h1.reshape(gb * n_pad, hid).astype(jnp.bfloat16)
    h2 = jnp.dot(h1_2d, w2, preferred_element_type=jnp.float32)     # [Gb*N, out]
    h2 = h2.reshape(gb, n_pad, out_dim).astype(jnp.bfloat16)
    out = jnp.einsum('gij,gjd->gid', a_norm, h2,
                     preferred_element_type=jnp.float32)            # [Gb, N, out]
    out_ref[...] = jnp.maximum(out, 0.0)


def semantic_gcn_forward_batched(node_features: jax.Array,
                                 adjacency: jax.Array,
                                 w1: jax.Array,
                                 w2: jax.Array,
                                 *,
                                 graphs_per_block: int = 4) -> jax.Array:
    """Semantic GCN layer for a batch of padded graphs via one gridded
    pallas_call, `graphs_per_block` (Gb) graphs per grid step.

    Choosing Gb (per performance review):
      * target M = Gb * N_pad >= 128 on v5e, >= 256 on v6e/v7x for MXU fill;
      * on v7x (64 MiB VMEM) keep Gb modest (~8-16 at the real 768/512/256
        dims with N_pad=128) and keep grid length >= 2 so both TCs get work.

    node_features: [G, N_pad, input_dim]  f32 (padded rows zero)
    adjacency    : [G, N_pad, N_pad]      f32 (padded rows/cols zero)
    w1           : [input_dim, hidden_dim]
    w2           : [hidden_dim, output_dim]
    returns      : [G, N_pad, output_dim] f32
    """
    g, n_pad, in_dim = node_features.shape
    hid = w1.shape[1]
    out_dim = w2.shape[1]
    gb = graphs_per_block

    # Pad the graph axis to a multiple of Gb with empty graphs (all-zero A ->
    # degree clamped to 1 -> zero output; sliced off below).
    g_pad = ((g + gb - 1) // gb) * gb
    if g_pad != g:
        node_features = jnp.pad(node_features, ((0, g_pad - g), (0, 0), (0, 0)))
        adjacency = jnp.pad(adjacency, ((0, g_pad - g), (0, 0), (0, 0)))

    # Feed the MXU bf16 weights (f32 accumulation stays in-kernel); also halves
    # the resident weight footprint in VMEM.
    w1_bf = w1.astype(jnp.bfloat16)
    w2_bf = w2.astype(jnp.bfloat16)

    out = pl.pallas_call(
        _semantic_gcn_kernel,
        out_shape=jax.ShapeDtypeStruct((g_pad, n_pad, out_dim), jnp.float32),
        grid=(g_pad // gb,),
        in_specs=[
            pl.BlockSpec((gb, n_pad, in_dim), lambda i: (i, 0, 0)),
            pl.BlockSpec((gb, n_pad, n_pad), lambda i: (i, 0, 0)),
            # Weights: same block index every step -> stay VMEM-resident.
            pl.BlockSpec((in_dim, hid), lambda i: (0, 0)),
            pl.BlockSpec((hid, out_dim), lambda i: (0, 0)),
        ],
        out_specs=pl.BlockSpec((gb, n_pad, out_dim), lambda i: (i, 0, 0)),
        compiler_params=pltpu.CompilerParams(
            dimension_semantics=("parallel",),
            vmem_limit_bytes=32 * 1024 * 1024,
        ),
    )(node_features, adjacency, w1_bf, w2_bf)
    return out[:g]


# ---------------------------------------------------------------------------
# Glue: deterministic parameter init (mirrors reset_parameters) and synthetic
# replacements for the BERT / dependency-parser front end.
# ---------------------------------------------------------------------------
def init_gcn_params(key, input_dim, hidden_dim, output_dim):
    k1, k2 = jax.random.split(key)
    stdv1 = 1.0 / math.sqrt(hidden_dim)   # 1/sqrt(W1.size(1))
    stdv2 = 1.0 / math.sqrt(output_dim)   # 1/sqrt(W2.size(1))
    w1 = jax.random.uniform(k1, (input_dim, hidden_dim), jnp.float32,
                            minval=-stdv1, maxval=stdv1)
    w2 = jax.random.uniform(k2, (hidden_dim, output_dim), jnp.float32,
                            minval=-stdv2, maxval=stdv2)
    return w1, w2


def build_chain_adjacency(n: int) -> jax.Array:
    """Synthetic dependency graph: edges i<->i+1 plus self-loops (matches the
    reference fallback parser + adjacency construction)."""
    a = jnp.eye(n, dtype=jnp.float32)
    if n > 1:
        off = jnp.eye(n, k=1, dtype=jnp.float32) + jnp.eye(n, k=-1, dtype=jnp.float32)
        a = a + off
    return jnp.minimum(a, 1.0)


def make_synthetic_word_embeddings(key, n: int, dim: int) -> jax.Array:
    # TODO(synk): stands in for frozen BERT [CLS]-token embeddings; BERT
    # itself (tokenizer + transformer) is not reproduced here.
    return jax.random.normal(key, (n, dim), jnp.float32)


# ---------------------------------------------------------------------------
# Pure-JAX f32 reference for correctness checking (unpadded, per graph).
# ---------------------------------------------------------------------------
def _reference_gcn(S, A, W1, W2):
    deg = jnp.maximum(jnp.sum(A, axis=-1, keepdims=True), 1.0)
    dis = deg ** -0.5
    An = dis * A * dis.T
    h1 = jnp.maximum(An @ (S @ W1), 0.0)
    return jnp.maximum(An @ (h1 @ W2), 0.0)


if __name__ == "__main__":
    # Real module dims (bert_dim / gcn_hidden_dim / output_dim) — lane-dense.
    input_dim, hidden_dim, output_dim = 768, 512, 256
    n_pad = 8            # common padded node count (multiple of 8 sublanes)
    graphs_per_block = 4  # Gb; grid length = 8/4 = 2 -> both v7x TCs busy

    # Eight "texts" with varying word counts, padded to n_pad.
    word_counts = (8, 6, 7, 5, 8, 4, 3, 6)

    master = jax.random.PRNGKey(0)
    kp, kf = jax.random.split(master)
    W1, W2 = init_gcn_params(kp, input_dim, hidden_dim, output_dim)

    feat_keys = jax.random.split(kf, len(word_counts))
    feats, adjs = [], []
    for n_words, k in zip(word_counts, feat_keys):
        S = make_synthetic_word_embeddings(k, n_words, input_dim)
        A = build_chain_adjacency(n_words)
        feats.append(jnp.zeros((n_pad, input_dim), jnp.float32).at[:n_words].set(S))
        adjs.append(jnp.zeros((n_pad, n_pad), jnp.float32).at[:n_words, :n_words].set(A))

    S_batch = jnp.stack(feats)   # [G, n_pad, input_dim]
    A_batch = jnp.stack(adjs)    # [G, n_pad, n_pad]

    # Single batched pallas_call; block once on the whole result.
    out_batch = semantic_gcn_forward_batched(
        S_batch, A_batch, W1, W2, graphs_per_block=graphs_per_block)
    out_batch = jax.block_until_ready(out_batch)

    # Per-graph verification against the pure-JAX f32 reference on unpadded
    # data.  Tolerance relaxed because the kernel feeds the MXU bf16 operands
    # (f32 accumulation).
    semantic_features_list = []
    adjacency_list = []
    for gidx, n_words in enumerate(word_counts):
        S = S_batch[gidx, :n_words]
        A = A_batch[gidx, :n_words, :n_words]
        got = out_batch[gidx, :n_words]
        ref = _reference_gcn(S, A, W1, W2)
        assert got.shape == (n_words, output_dim)
        assert jnp.allclose(got, ref, atol=3e-2, rtol=3e-2), "mismatch vs reference"
        # Padded rows must come out exactly zero (zero A rows -> 0 after ReLU).
        assert bool(jnp.all(out_batch[gidx, n_words:] == 0.0))
        semantic_features_list.append(got)
        adjacency_list.append(A)

    print("KERNEL_OK")
</pallas_src>

<mosaic_0001>
module attributes {stable_mosaic.version = 11 : i64} {
  func.func @_semantic_gcn_kernel(%arg0: i32, %arg1: memref<4x8x768xf32, #tpu.memory_space<vmem>>, %arg2: memref<4x8x8xf32, #tpu.memory_space<vmem>>, %arg3: memref<768x512xbf16, #tpu.memory_space<vmem>>, %arg4: memref<512x256xbf16, #tpu.memory_space<vmem>>, %arg5: memref<4x8x256xf32, #tpu.memory_space<vmem>>) attributes {dimension_semantics = [#tpu.dimension_semantics<parallel>], iteration_bounds = array<i64: 2>, scalar_prefetch = 0 : i64, scratch_operands = 0 : i64, tpu.core_type = #tpu.core_type<tc>, window_params = [{transform_indices = @transform_0, window_bounds = array<i64: 4, 8, 768>}, {transform_indices = @transform_1, window_bounds = array<i64: 4, 8, 8>}, {pipeline_mode = #tpu.pipeline_mode<synchronous>, transform_indices = @transform_2, window_bounds = array<i64: 768, 512>}, {pipeline_mode = #tpu.pipeline_mode<synchronous>, transform_indices = @transform_3, window_bounds = array<i64: 512, 256>}, {transform_indices = @transform_4, window_bounds = array<i64: 4, 8, 256>}]} {
    %c0 = arith.constant 0 : index
    %c0_0 = arith.constant 0 : index
    %c0_1 = arith.constant 0 : index
    %0 = vector.load %arg2[%c0, %c0_0, %c0_1] : memref<4x8x8xf32, #tpu.memory_space<vmem>>, vector<4x8x8xf32>
    %cst = arith.constant dense<0.000000e+00> : vector<4x8xf32>
    %1 = vector.multi_reduction <add>, %0, %cst [2] : vector<4x8x8xf32> to vector<4x8xf32>
    %2 = vector.shape_cast %1 : vector<4x8xf32> to vector<4x8x1xf32>
    %cst_2 = arith.constant 1.000000e+00 : f32
    %3 = vector.broadcast %cst_2 : f32 to vector<4x8x1xf32>
    %4 = arith.maximumf %2, %3 : vector<4x8x1xf32>
    %5 = math.rsqrt %4 : vector<4x8x1xf32>
    %6 = vector.broadcast %5 : vector<4x8x1xf32> to vector<4x8x8xf32>
    %7 = arith.mulf %6, %0 : vector<4x8x8xf32>
    %8 = tpu.transpose %5, [0, 2, 1] : vector<4x8x1xf32> -> vector<4x1x8xf32>
    %9 = vector.broadcast %8 : vector<4x1x8xf32> to vector<4x8x8xf32>
    %10 = arith.mulf %7, %9 : vector<4x8x8xf32>
    %11 = arith.truncf %10 : vector<4x8x8xf32> to vector<4x8x8xbf16>
    %c0_3 = arith.constant 0 : index
    %c0_4 = arith.constant 0 : index
    %12 = vector.load %arg3[%c0_3, %c0_4] : memref<768x512xbf16, #tpu.memory_space<vmem>>, vector<768x512xbf16>
    %c0_5 = arith.constant 0 : index
    %c0_6 = arith.constant 0 : index
    %13 = vector.load %arg4[%c0_5, %c0_6] : memref<512x256xbf16, #tpu.memory_space<vmem>>, vector<512x256xbf16>
    %c0_7 = arith.constant 0 : index
    %c0_8 = arith.constant 0 : index
    %c0_9 = arith.constant 0 : index
    %14 = vector.load %arg1[%c0_7, %c0_8, %c0_9] : memref<4x8x768xf32, #tpu.memory_space<vmem>>, vector<4x8x768xf32>
    %15 = vector.shape_cast %14 : vector<4x8x768xf32> to vector<32x768xf32>
    %16 = arith.truncf %15 : vector<32x768xf32> to vector<32x768xbf16>
    %cst_10 = arith.constant dense<0.000000e+00> : vector<32x512xf32>
    %17 = tpu.matmul %16, %12, %cst_10 {dimension_numbers = #tpu.dot_dimension_numbers<[1], [0], [0], [1], [0, 0, 1, 1], [], []>} : vector<32x768xbf16>, vector<768x512xbf16>, vector<32x512xf32> -> vector<32x512xf32>
    %18 = vector.shape_cast %17 : vector<32x512xf32> to vector<4x8x512xf32>
    %19 = arith.truncf %18 : vector<4x8x512xf32> to vector<4x8x512xbf16>
    "tpu.trace_start"() <{level = 10 : i32, message = "gij,gjd->gid"}> : () -> ()
    %cst_11 = arith.constant dense<0.000000e+00> : vector<4x8x512xf32>
    %20 = tpu.matmul %11, %19, %cst_11 {dimension_numbers = #tpu.dot_dimension_numbers<[2], [1], [1], [2], [0, 0, 0, 1, 1, 2], [0], [0]>} : vector<4x8x8xbf16>, vector<4x8x512xbf16>, vector<4x8x512xf32> -> vector<4x8x512xf32>
    "tpu.trace_stop"() : () -> ()
    %cst_12 = arith.constant 0.000000e+00 : f32
    %21 = vector.broadcast %cst_12 : f32 to vector<4x8x512xf32>
    %22 = arith.maximumf %20, %21 : vector<4x8x512xf32>
    %23 = vector.shape_cast %22 : vector<4x8x512xf32> to vector<32x512xf32>
    %24 = arith.truncf %23 : vector<32x512xf32> to vector<32x512xbf16>
    %cst_13 = arith.constant dense<0.000000e+00> : vector<32x256xf32>
    %25 = tpu.matmul %24, %13, %cst_13 {dimension_numbers = #tpu.dot_dimension_numbers<[1], [0], [0], [1], [0, 0, 1, 1], [], []>} : vector<32x512xbf16>, vector<512x256xbf16>, vector<32x256xf32> -> vector<32x256xf32>
    %26 = vector.shape_cast %25 : vector<32x256xf32> to vector<4x8x256xf32>
    %27 = arith.truncf %26 : vector<4x8x256xf32> to vector<4x8x256xbf16>
    "tpu.trace_start"() <{level = 10 : i32, message = "gij,gjd->gid"}> : () -> ()
    %cst_14 = arith.constant dense<0.000000e+00> : vector<4x8x256xf32>
    %28 = tpu.matmul %11, %27, %cst_14 {dimension_numbers = #tpu.dot_dimension_numbers<[2], [1], [1], [2], [0, 0, 0, 1, 1, 2], [0], [0]>} : vector<4x8x8xbf16>, vector<4x8x256xbf16>, vector<4x8x256xf32> -> vector<4x8x256xf32>
    "tpu.trace_stop"() : () -> ()
    %cst_15 = arith.constant 0.000000e+00 : f32
    %29 = vector.broadcast %cst_15 : f32 to vector<4x8x256xf32>
    %30 = arith.maximumf %28, %29 : vector<4x8x256xf32>
    %c0_16 = arith.constant 0 : index
    %c0_17 = arith.constant 0 : index
    %c0_18 = arith.constant 0 : index
    %31 = vector.load %arg5[%c0_16, %c0_17, %c0_18] : memref<4x8x256xf32, #tpu.memory_space<vmem>>, vector<4x8x256xf32>
    tpu.vector_store %arg5[%c0_16, %c0_17, %c0_18], %30 {strides = array<i32>} : memref<4x8x256xf32, #tpu.memory_space<vmem>>, vector<4x8x256xf32>,
    return
  }
  func.func @transform_0(%arg0: i32) -> (i32, i32, i32) {
    %c0_i32 = arith.constant 0 : i32
    %c0_i32_0 = arith.constant 0 : i32
    %c0_i32_1 = arith.constant 0 : i32
    return %arg0, %c0_i32, %c0_i32_0 : i32, i32, i32
  }
  func.func @transform_1(%arg0: i32) -> (i32, i32, i32) {
    %c0_i32 = arith.constant 0 : i32
    %c0_i32_0 = arith.constant 0 : i32
    %c0_i32_1 = arith.constant 0 : i32
    return %arg0, %c0_i32, %c0_i32_0 : i32, i32, i32
  }
  func.func @transform_2(%arg0: i32) -> (i32, i32) {
    %c0_i32 = arith.constant 0 : i32
    %c0_i32_0 = arith.constant 0 : i32
    %c0_i32_1 = arith.constant 0 : i32
    return %c0_i32, %c0_i32_0 : i32, i32
  }
  func.func @transform_3(%arg0: i32) -> (i32, i32) {
    %c0_i32 = arith.constant 0 : i32
    %c0_i32_0 = arith.constant 0 : i32
    %c0_i32_1 = arith.constant 0 : i32
    return %c0_i32, %c0_i32_0 : i32, i32
  }
  func.func @transform_4(%arg0: i32) -> (i32, i32, i32) {
    %c0_i32 = arith.constant 0 : i32
    %c0_i32_0 = arith.constant 0 : i32
    %c0_i32_1 = arith.constant 0 : i32
    return %arg0, %c0_i32, %c0_i32_0 : i32, i32, i32
  }
}

</mosaic_0001>

<bundles_post_ra>
// kernel: tpu_custom_call.1
= control target key start
LH: loop header
LB: loop body
LE: loop exit
PB: predicated region body
PF: predicated region fallthrough
CT: control target
= control target key end

     0   :  { %s4791_s0 = inlined_call_operand.hbm [shape: f32[8,8,768], index: 0, kind: input, shape index: {}]   ;;  %s4792_s1 = inlined_call_operand.hbm [shape: f32[8,8,8], index: 1, kind: input, shape index: {}]   ;;  %s4793_s2 = inlined_call_operand.hbm [shape: bf16[768,512], index: 2, kind: input, shape index: {}]   ;;  %s4794_s3 = inlined_call_operand.hbm [shape: bf16[512,256], index: 3, kind: input, shape index: {}]   ;;  %s4795_s4 = inlined_call_operand.hbm [shape: f32[8,8,256], index: 4, kind: output, shape index: {}]  }
   0x1   :  { %4801 = sst [smem:[#allocation16_spill]] %s4791_s0 }
   0x2   :  { %4802 = sst [smem:[#allocation17_spill]] %s4793_s2 }
   0x3   :  { %9 = vsyncpa [#allocation3], 0 }
   0x4   :  { %11 = vsyncpa [#allocation3 + $0x1], 0 }
   0x5   :  { %12 = vsyncpa [#allocation6], 0 }
   0x6   :  { %14 = vsyncpa [#allocation6 + $0x1], 0 }
   0x7   :  { %15 = vsyncpa [#allocation9], 0 }
   0x8   :  { %16 = vsyncpa [#allocation4], 0 }
   0x9   :  { %18 = vsyncpa [#allocation4 + $0x1], 0  ;;  %s4297_s15 = smov 0   ;;  %s4299_s16 = smov 0  }
   0xa   :  { %s4301_s17 = smov 0   ;;  %s4303_s18 = smov 0  }
   0xb LB: > { %s4318_s19 = sadd.s32 4294967295, %s4256_s18   ;;  %s3238_s20 = sadd.s32 4294967294, %s4256_s18   ;;  %s4256_s18 = sphi %s4303_s18, %s4825_s18   ;;  %s4252_s17 = sphi %s4301_s17, %s4824_s17   ;;  %s4248_s16 = sphi %s4299_s16, %s4823_s16   ;;  %s4244_s15 = sphi %s4297_s15, %s4822_s15  }
   0xc   : > { %p44_p0 = scmp.ne.s32.totalorder %s4248_s16, %s4244_s15  ;;  %p4796_p1 = scmp.eq.s32.totalorder %s4318_s19, 0 }
   0xd   : > { %p142_p3 = scmp.eq.s32.totalorder %s3238_s20, 1  ;;  %p3239_p5 = scmp.ge.s32.totalorder %s4256_s18, 1 }
   0xe   : > { %p4327_p4 = por %p4796_p1, %p44_p0  ;;  %p149_p7 = scmp.lt.s32.totalorder %s4256_s18, 3 }
   0xf   : > { %p4332_p6 = por %p142_p3, %p44_p0  ;;  %s4258_s24 = smov [#allocation7]  }
  0x10   : > { %s4803_s21 = scalar_select %p4327_p4, 1, 0 }
  0x11   : > { %s4804_s22 = scalar_select %p4332_p6, 1, 0 }
  0x12   : > { %p4337_p8 = pnand %p3239_p5, %p149_p7  ;;  %s161_s25 = sshll.u32 %s4258_s24, 4  ;;  %s4341_s25 = int_to_ptr.vmem [resolvable:$true] %s161_s25 }
  0x13   : > { %s4259_s27 = smov [#allocation8]   ;;  %s4807_s2 = sld [smem:[#allocation17_spill]] }
  0x14   : > { %p3600_p9 = pneg %p4337_p8  ;;  %s174_s28 = sshll.u32 %s4259_s27, 4  ;;  %s4352_s28 = int_to_ptr.vmem [resolvable:$true] %s174_s28 }
  0x16   : > { %p4348_p11 = pnand %p3600_p9, %p4796_p1 }
  0x18   : > { %p4064_p13 = pneg %p4348_p11 }
  0x19   : > { %s4062_s5 = scalar_lea.hbm %s4807_s2, 24576 }
  0x1a   : > { %p4063_p12 = scmp.ne.s32.totalorder %s4807_s2, %s4062_s5  ;;  %p4069_p5 = scmp.lt.u32.totalorder %s4062_s5, %s4807_s2 }
  0x1c   : > { %p4065_p0 = pnand %p4064_p13, %p4063_p12 }
  0x1e   : > { %p4066_p3 = pneg %p4065_p0 }
  0x20   : > { %p4071_p7 = pnand %p4069_p5, %p4066_p3 }
  0x22   : > { %4074 = shalt.err (!%p4071_p7)
}
  0x23   : > { %s4075_s10 = scalar_lea.vmem %s4341_s25, 24576  ;;  %p4083_p2 = scmp.lt.s32.totalorder %s4341_s25, %s4341_s25 }
  0x24   : > { %p4076_p9 = scmp.ne.s32.totalorder %s4341_s25, %s4075_s10  ;;  %p4084_p12 = scmp.lt.s32.totalorder %s4075_s10, %s4075_s10 }
  0x26   : > { %p4078_p10 = pnand %p4076_p9, %p4064_p13  ;;  %p4085_p0 = por %p4084_p12, %p4083_p2 }
  0x28   : > { %p4079_p1 = pneg %p4078_p10 }
  0x2a   : > { %p4086_p6 = pnand %p4085_p0, %p4079_p1 }
  0x2c   : > { %4089 = shalt.err (!%p4086_p6)
}
  0x2d   : > { %s4260_s11 = smov 256   ;;  %s4261_s12 = smov 16  }
  0x2e   : > { %3603 = dma.hbm_to_vmem [thread:$0]  (!%p4348_p11), %s4807_s2, 24576, %s4341_s25, [#allocation6], %s4260_s11, %s4260_s11, %s4261_s12  }
  0x2f   : > { %s4090_s27 = scalar_lea.hbm %s4794_s3, 8192 }
  0x30   : > { %p4091_p2 = scmp.ne.s32.totalorder %s4794_s3, %s4090_s27  ;;  %p4097_p10 = scmp.lt.u32.totalorder %s4090_s27, %s4794_s3 }
  0x32   : > { %p4093_p1 = pnand %p4091_p2, %p4064_p13 }
  0x34   : > { %p4094_p6 = pneg %p4093_p1 }
  0x36   : > { %p4099_p3 = pnand %p4097_p10, %p4094_p6 }
  0x38   : > { %4102 = shalt.err (!%p4099_p3)
}
  0x39   : > { %s4103_s25 = scalar_lea.vmem %s4352_s28, 8192  ;;  %p4111_p12 = scmp.lt.s32.totalorder %s4352_s28, %s4352_s28 }
  0x3a   : > { %p4104_p5 = scmp.ne.s32.totalorder %s4352_s28, %s4103_s25  ;;  %p4112_p0 = scmp.lt.s32.totalorder %s4103_s25, %s4103_s25 }
  0x3c   : > { %p4106_p7 = pnand %p4104_p5, %p4064_p13  ;;  %p4113_p2 = por %p4112_p0, %p4111_p12 }
  0x3e   : > { %p4107_p9 = pneg %p4106_p7 }
  0x40   : > { %p4114_p1 = pnand %p4113_p2, %p4107_p9 }
  0x42   : > { %4117 = shalt.err (!%p4114_p1)
}
  0x43   : > { %s4797_s7 = smov 128   ;;  %s4800_s8 = smov 8  }
  0x44   : > { %3606 = dma.hbm_to_vmem [thread:$0]  (!%p4348_p11), %s4794_s3, 8192, %s4352_s28, [#allocation9], %s4797_s7, %s4797_s7, %s4800_s8  }
  0x45   : > { %s4410_s11 = sadd.s32 1, %s4256_s18   ;;  %s31_s13 = sadd.s32 1, %s4252_s17 }
  0x46   : > { %s28_s12 = ssub.s32 %s4256_s18, %s4410_s11  ;;  %p38_p6 = scmp.ne.s32.totalorder %s4252_s17, %s4248_s16 }
  0x47   : > { %p29_p13 = scmp.eq.s32.totalorder %s28_s12, 0  ;;  %p39_p10 = scmp.eq.s32.totalorder %s4256_s18, 0 }
  0x48   : > { %p4808_p5 = scmp.eq.s32.totalorder %s4318_s19, 1  ;;  %p3620_p9 = scmp.lt.s32.totalorder %s4256_s18, 2 }
  0x49   : > { %s4419_s14 = scalar_select %p29_p13, %s4252_s17, %s31_s13  }
  0x4a   : > { %p40_p3 = por %p39_p10, %p38_p6  ;;  %p4423_p7 = por %p4808_p5, %p38_p6 }
  0x4b   : > { %s4429_s20 = sand.u32 1, %s4252_s17   ;;  %s3584_s24 = smul.u32 3072, %s4256_s18 }
  0x4c   : > { %s4809_s26 = scalar_select %p4423_p7, 1, 0 }
  0x4d   : > { %s3583_s28 = smul.u32 192, %s4429_s20  ;;  %p4433_p11 = pnand %p3620_p9, %p40_p3 }
  0x4e   : > { %s4811_s0 = sld [smem:[#allocation16_spill]]  ;;  %s210_s9 = sand.u32 1, %s4256_s18  }
  0x4f   : > { %s192_s6 = scalar_lea.vmem [#allocation2], %s3583_s28  ;;  %s189_s10 = scalar_lea.sflag [#allocation3], %s4429_s20 }
  0x50   : > { %s200_s25 = sshll.u32 %s192_s6, 4  ;;  %p4120_p0 = pneg %p4433_p11  ;;  %s4442_s25 = int_to_ptr.vmem [resolvable:$true] %s200_s25 }
  0x54   : > { %s4440_s5 = scalar_lea.hbm %s4811_s0, %s3584_s24  ;;  %s4123_s29 = scalar_lea.hbm %s4811_s0, 6144 }
  0x55   : > { %s4118_s12 = scalar_lea.hbm %s4440_s5, 3072  ;;  %p4124_p13 = scmp.lt.u32.totalorder %s4440_s5, %s4811_s0 }
  0x56   : > { %p4119_p12 = scmp.ne.s32.totalorder %s4440_s5, %s4118_s12  ;;  %p4125_p6 = scmp.lt.u32.totalorder %s4123_s29, %s4118_s12 }
  0x57   : > { %p4127_p3 = scmp.lt.u32.totalorder %s4118_s12, %s4440_s5 }
  0x58   : > { %p4121_p2 = pnand %p4120_p0, %p4119_p12  ;;  %p4126_p10 = por %p4125_p6, %p4124_p13 }
  0x5a   : > { %p4122_p1 = pneg %p4121_p2  ;;  %p4128_p5 = por %p4127_p3, %p4126_p10 }
  0x5c   : > { %p4129_p9 = pnand %p4128_p5, %p4122_p1 }
  0x5e   : > { %4132 = shalt.err (!%p4129_p9)
}
  0x5f   : > { %s4133_s28 = scalar_lea.vmem %s4442_s25, 3072  ;;  %s4264_s6 = smov [#allocation2]  }
  0x60   : > { %p4134_p12 = scmp.ne.s32.totalorder %s4442_s25, %s4133_s28  ;;  %s4138_s13 = sshll.u32 %s4264_s6, 4  ;;  %s4139_s13 = int_to_ptr.vmem [resolvable:$false] %s4138_s13 }
  0x61   : > { %s4140_s7 = scalar_lea.vmem %s4139_s13, 6144  ;;  %p4141_p4 = scmp.lt.s32.totalorder %s4442_s25, %s4139_s13 }
  0x62   : > { %p4136_p2 = pnand %p4134_p12, %p4120_p0  ;;  %p4142_p13 = scmp.lt.s32.totalorder %s4140_s7, %s4133_s28 }
  0x64   : > { %p4137_p7 = pneg %p4136_p2  ;;  %p4143_p6 = por %p4142_p13, %p4141_p4 }
  0x66   : > { %p4144_p10 = pnand %p4143_p6, %p4137_p7 }
  0x68   : > { %4147 = shalt.err (!%p4144_p10)
}
  0x69   : > { %s4265_s12 = smov 768   ;;  %s4266_s24 = smov 48  }
  0x6a   : > { %3610 = dma.hbm_to_vmem [thread:$0]  (!%p4433_p11), %s4440_s5, 3072, %s4442_s25, %s189_s10, %s4265_s12, %s4265_s12, %s4266_s24  }
  0x6b   : > { %s3246_s29 = sshll.u32 %s4429_s20, 5  ;;  %s3540_s30 = sshll.u32 %s4256_s18, 9 }
  0x6c   : > { %s4478_s13 = scalar_lea.hbm %s4792_s1, %s3540_s30  ;;  %s214_s7 = scalar_lea.vmem [#allocation5], %s3246_s29 }
  0x6d   : > { %s221_s8 = sshll.u32 %s214_s7, 4  ;;  %s4484_s0 = scalar_lea.sflag [#allocation6], %s210_s9  ;;  %s4480_s8 = int_to_ptr.vmem [resolvable:$true] %s221_s8 }
  0x6e   : > { %s4148_s2 = scalar_lea.hbm %s4478_s13, 512  ;;  %s4153_s25 = scalar_lea.hbm %s4792_s1, 1024 }
  0x6f   : > { %p4149_p4 = scmp.ne.s32.totalorder %s4478_s13, %s4148_s2  ;;  %p4154_p3 = scmp.lt.u32.totalorder %s4478_s13, %s4792_s1 }
  0x70   : > { %p4155_p5 = scmp.lt.u32.totalorder %s4153_s25, %s4148_s2  ;;  %p4157_p12 = scmp.lt.u32.totalorder %s4148_s2, %s4478_s13 }
  0x71   : > { %p4151_p7 = pnand %p4149_p4, %p4120_p0 }
  0x72   : > { %p4156_p9 = por %p4155_p5, %p4154_p3 }
  0x73   : > { %p4152_p1 = pneg %p4151_p7 }
  0x74   : > { %p4158_p2 = por %p4157_p12, %p4156_p9 }
  0x76   : > { %p4159_p13 = pnand %p4158_p2, %p4152_p1 }
  0x78   : > { %4162 = shalt.err (!%p4159_p13)
}
  0x79   : > { %s4163_s9 = scalar_lea.vmem %s4480_s8, 512  ;;  %s4267_s24 = smov [#allocation5]  }
  0x7a   : > { %p4164_p6 = scmp.ne.s32.totalorder %s4480_s8, %s4163_s9  ;;  %s4168_s29 = sshll.u32 %s4267_s24, 4  ;;  %s4169_s29 = int_to_ptr.vmem [resolvable:$false] %s4168_s29 }
  0x7b   : > { %s4170_s30 = scalar_lea.vmem %s4169_s29, 1024  ;;  %p4171_p7 = scmp.lt.s32.totalorder %s4480_s8, %s4169_s29 }
  0x7c   : > { %p4166_p10 = pnand %p4164_p6, %p4120_p0  ;;  %p4172_p3 = scmp.lt.s32.totalorder %s4170_s30, %s4163_s9 }
  0x7e   : > { %p4167_p4 = pneg %p4166_p10  ;;  %p4173_p5 = por %p4172_p3, %p4171_p7 }
  0x80   : > { %p4174_p9 = pnand %p4173_p5, %p4167_p4 }
  0x82   : > { %4177 = shalt.err (!%p4174_p9)
}
  0x83   : > { %s4812_s2 = smov 8   ;;  %s4813_s6 = smov 128  }
  0x84   : > { %3613 = dma.hbm_to_vmem [thread:$0]  (!%p4433_p11), %s4478_s13, 512, %s4480_s8, %s4484_s0, %s4813_s6, %s4813_s6, %s4812_s2  }
  0x85   : > { %233 = sbr.rel (%p4337_p8) target bundleno = 1389 (0x56d), region = 36  ;;  %s4516_s28 = sand.u32 (!%p4337_p8), 1, %s4248_s16  }
  0x86   : > { %s3585_s7 = smul.u32 (!%p4337_p8), 192, %s4516_s28  ;;  %s236_s20 = scalar_lea.sflag (!%p4337_p8), [#allocation3], %s4516_s28 }
  0x87   : > { %p4814_p0 = scmp.ne.s32.totalorder (!%p4337_p8), %s4803_s21, 0 }
  0x88   : > { %s4520_s5 = scalar_lea.vmem (!%p4337_p8), [#allocation2], %s3585_s7 }
  0x8c   : > { %4223 = dma.done.wait (%p4814_p0), %s236_s20, 3072  }
  0x8d   : > { %4225 = vsyncadd (%p4814_p0), %s236_s20, 4294964224  ;;  %s244_s0 = sand.u32 1, %s4318_s19   ;;  %s3250_s23 = sshll.u32 %s4516_s28, 5 }
  0x8e   : > { %s245_s8 = scalar_lea.sflag [#allocation6], %s244_s0  ;;  %s4528_s27 = scalar_lea.vmem [#allocation5], %s3250_s23 }
  0x8f   : > { %4227 = dma.done.wait (%p4814_p0), %s245_s8, 512  }
  0x90   : > { %4229 = vsyncadd (%p4814_p0), %s245_s8, 4294966784  ;;  %p4815_p8 = scmp.eq.s32.totalorder %s4318_s19, 0 }
  0x92   : > { %4231 = dma.done.wait (%p4815_p8), [#allocation6], 24576   ;;  %p4816_p11 = pmov %p4815_p8 }
  0x93   : > { %p4817_p1 = pmov %p4815_p8 }
  0x94   : > { %4233 = vsyncadd (%p4816_p11), [#allocation6], 4294942720 }
  0x95   : > { %4235 = dma.done.wait (%p4817_p1), [#allocation9], 8192   ;;  %p4818_p12 = pmov %p4817_p1 }
  0x96   : > { %v3668_v0 = vld [vmem:[#allocation7 + $0x4] ss:$16 sps:$4 sm:$0xff]   ;;  %v3672_v2 = vld [vmem:[#allocation7] ss:$16 sps:$4 sm:$0xff]   ;;  %vm294_vm0 = vcmask 64512   ;;  %v728_v50 = vld [vmem:[%s4520_s5 + $0x8] sm:$0xff] }
  0x97   : > { %4237 = vsyncadd (%p4818_p12), [#allocation9], 4294959104  ;;  %v3670_v1 = vld [vmem:[#allocation7 + $0x204] ss:$16 sps:$4 sm:$0xff]   ;;  %1723 = vmatprep.subr.bf16.mxu1 %v3668_v0  ;;  %v3673_v3 = vld [vmem:[#allocation7 + $0x200] ss:$16 sps:$4 sm:$0xff]  }
  0x98   : > { %1776 = vmatprep.subr.bf16.mxu0 %v3670_v1  ;;  %v3674_v4 = vld [vmem:[#allocation7 + $0x24] ss:$16 sps:$4 sm:$0xff]   ;;  %1724 = vmatpush1.bf16.msra.mxu1 %v3672_v2  ;;  %v3678_v6 = vld [vmem:[#allocation7 + $0x20] ss:$16 sps:$4 sm:$0xff]   ;;  %v734_v51 = vld [vmem:[%s4520_s5 + $0x38] sm:$0xff]  ;;  %vm2060_vm1 = vcmask 1043456  }
  0x99   : > { %1777 = vmatpush1.bf16.msra.mxu0 %v3673_v3  ;;  %v3676_v5 = vld [vmem:[#allocation7 + $0x224] ss:$16 sps:$4 sm:$0xff]   ;;  %1725 = vmatprep.subr.bf16.mxu1 %v3674_v4  ;;  %v3679_v7 = vld [vmem:[#allocation7 + $0x220] ss:$16 sps:$4 sm:$0xff]   ;;  %v4546_v53 = vpack.c.bf16 %v734_v51, %v728_v50  ;;  %v730_v54 = vld [vmem:[%s4520_s5 + $0x18] sm:$0xff]  ;;  %s3253_s21 = sshll.u32 %s4516_s28, 6 }
  0x9a   : > { %1778 = vmatprep.subr.bf16.mxu0 %v3676_v5  ;;  %v3680_v8 = vld [vmem:[#allocation7 + $0x44] ss:$16 sps:$4 sm:$0xff]   ;;  %v3684_v10 = vld [vmem:[#allocation7 + $0x40] ss:$16 sps:$4 sm:$0xff]   ;;  %v736_v55 = vld [vmem:[%s4520_s5 + $0x48] sm:$0xff]  ;;  %s4730_s13 = scalar_lea.vmem [#allocation10], %s3253_s21 }
  0x9b   : > { %v3682_v9 = vld [vmem:[#allocation7 + $0x244] ss:$16 sps:$4 sm:$0xff]   ;;  %v3685_v11 = vld [vmem:[#allocation7 + $0x240] ss:$16 sps:$4 sm:$0xff]   ;;  %v4550_v57 = vpack.c.bf16 %v736_v55, %v730_v54  ;;  %1755 = vmatprep.mubr.bf16.mxu1 %v4546_v53  ;;  %v291_v58 = vld [vmem:[%s4528_s27 + $0x8] sm:$0xff]  ;;  %s3123_s25 = sshll.u32 %s4730_s13, 4  ;;  %s4740_s25 = int_to_ptr.vmem [resolvable:$true] %s3123_s25 }
  0x9c   : > { %1726 = vmatpush1.bf16.msra.mxu1 %v3678_v6  ;;  %v3686_v12 = vld [vmem:[#allocation7 + $0x64] ss:$16 sps:$4 sm:$0xff]   ;;  %v3690_v14 = vld [vmem:[#allocation7 + $0x60] ss:$16 sps:$4 sm:$0xff]   ;;  %v298_v61 = vsel %vm294_vm0, %v291_v58, 0.0  ;;  %v748_v50 = vld [vmem:[%s4520_s5 + $0xa8] sm:$0xff] }
  0x9d   : > { %1779 = vmatpush1.bf16.msra.mxu0 %v3679_v7  ;;  %1727 = vmatprep.subr.bf16.mxu1 %v3680_v8  ;;  %v3688_v13 = vld [vmem:[#allocation7 + $0x264] ss:$16 sps:$4 sm:$0xff]   ;;  %v3691_v15 = vld [vmem:[#allocation7 + $0x260] ss:$16 sps:$4 sm:$0xff]   ;;  %v4580_v51 = vld [vmem:[%s4528_s27 + $0x18] sm:$0xff]  ;;  %s3542_s10 = sshll.u32 %s4318_s19, 10 }
  0x9e   : > { %1780 = vmatprep.subr.bf16.mxu0 %v3682_v9  ;;  %v3692_v16 = vld [vmem:[#allocation7 + $0x84] ss:$16 sps:$4 sm:$0xff]   ;;  %v3696_v18 = vld [vmem:[#allocation7 + $0x80] ss:$16 sps:$4 sm:$0xff]   ;;  %1808 = vmatprep.mubr.bf16.mxu0 %v4550_v57  ;;  %v304_v55 = vsel %vm294_vm0, %v4580_v51, 0.0  ;;  %s4745_s24 = scalar_lea.hbm %s4795_s4, %s3542_s10  ;;  %s3109_s29 = scalar_lea.sflag [#allocation4], %s4516_s28 }
  0x9f   : > { %v3694_v17 = vld [vmem:[#allocation7 + $0x284] ss:$16 sps:$4 sm:$0xff]   ;;  %v3697_v19 = vld [vmem:[#allocation7 + $0x280] ss:$16 sps:$4 sm:$0xff]   ;;  %s4178_s19 = scalar_lea.vmem %s4740_s25, 1024  ;;  %p4819_p13 = scmp.ne.s32.totalorder %s4809_s26, 0 }
  0xa0   : > { %1728 = vmatpush1.bf16.msra.mxu1 %v3684_v10  ;;  %v3698_v20 = vld [vmem:[#allocation7 + $0xa4] ss:$16 sps:$4 sm:$0xff]   ;;  %v3702_v22 = vld [vmem:[#allocation7 + $0xa0] ss:$16 sps:$4 sm:$0xff]   ;;  %p4179_p2 = scmp.ne.s32.totalorder %s4740_s25, %s4178_s19  ;;  %s4269_s30 = smov [#allocation10]  }
  0xa1   : > { %1781 = vmatpush1.bf16.msra.mxu0 %v3685_v11  ;;  %1729 = vmatprep.subr.bf16.mxu1 %v3686_v12  ;;  %v3700_v21 = vld [vmem:[#allocation7 + $0x2a4] ss:$16 sps:$4 sm:$0xff]   ;;  %v3703_v23 = vld [vmem:[#allocation7 + $0x2a0] ss:$16 sps:$4 sm:$0xff]   ;;  %s4182_s2 = sshll.u32 %s4269_s30, 4  ;;  %s4183_s2 = int_to_ptr.vmem [resolvable:$false] %s4182_s2 }
  0xa2   : > { %1782 = vmatprep.subr.bf16.mxu0 %v3688_v13  ;;  %v3704_v24 = vld [vmem:[#allocation7 + $0xc4] ss:$16 sps:$4 sm:$0xff]   ;;  %v3708_v26 = vld [vmem:[#allocation7 + $0xc0] ss:$16 sps:$4 sm:$0xff]   ;;  %p4180_p6 = pnand %p4179_p2, %p4819_p13  ;;  %s4184_s6 = scalar_lea.vmem %s4183_s2, 2048 }
  0xa3   : > { %v3706_v25 = vld [vmem:[#allocation7 + $0x2c4] ss:$16 sps:$4 sm:$0xff]   ;;  %v3709_v27 = vld [vmem:[#allocation7 + $0x2c0] ss:$16 sps:$4 sm:$0xff]   ;;  %p4185_p4 = scmp.lt.s32.totalorder %s4740_s25, %s4183_s2  ;;  %p4186_p7 = scmp.lt.s32.totalorder %s4184_s6, %s4178_s19 }
  0xa4   : > { %1730 = vmatpush1.bf16.msra.mxu1 %v3690_v14  ;;  %v3710_v28 = vld [vmem:[#allocation7 + $0xe4] ss:$16 sps:$4 sm:$0xff]   ;;  %v3714_v30 = vld [vmem:[#allocation7 + $0xe0] ss:$16 sps:$4 sm:$0xff]   ;;  %p4181_p10 = pneg %p4180_p6 }
  0xa5   : > { %1783 = vmatpush1.bf16.msra.mxu0 %v3691_v15  ;;  %1731 = vmatprep.subr.bf16.mxu1 %v3692_v16  ;;  %v3712_v29 = vld [vmem:[#allocation7 + $0x2e4] ss:$16 sps:$4 sm:$0xff]   ;;  %v3715_v31 = vld [vmem:[#allocation7 + $0x2e0] ss:$16 sps:$4 sm:$0xff]   ;;  %v3769_v15 = vld [vmem:[#allocation7 + $0xc] ss:$16 sps:$4 sm:$0xff]   ;;  %p4187_p3 = por %p4186_p7, %p4185_p4 }
  0xa6   : > { %1784 = vmatprep.subr.bf16.mxu0 %v3694_v17  ;;  %v3716_v32 = vld [vmem:[#allocation7 + $0x104] ss:$16 sps:$4 sm:$0xff]   ;;  %v3720_v34 = vld [vmem:[#allocation7 + $0x100] ss:$16 sps:$4 sm:$0xff]  }
  0xa7   : > { %v3718_v33 = vld [vmem:[#allocation7 + $0x304] ss:$16 sps:$4 sm:$0xff]   ;;  %v3721_v35 = vld [vmem:[#allocation7 + $0x300] ss:$16 sps:$4 sm:$0xff]   ;;  %p4188_p5 = pnand %p4187_p3, %p4181_p10 }
  0xa8   : > { %1732 = vmatpush1.bf16.msra.mxu1 %v3696_v18  ;;  %v3722_v36 = vld [vmem:[#allocation7 + $0x124] ss:$16 sps:$4 sm:$0xff]   ;;  %v3726_v39 = vld [vmem:[#allocation7 + $0x120] ss:$16 sps:$4 sm:$0xff]  }
  0xa9   : > { %1785 = vmatpush1.bf16.msra.mxu0 %v3697_v19  ;;  %1733 = vmatprep.subr.bf16.mxu1 %v3698_v20  ;;  %v3724_v37 = vld [vmem:[#allocation7 + $0x324] ss:$16 sps:$4 sm:$0xff]   ;;  %v3727_v41 = vld [vmem:[#allocation7 + $0x320] ss:$16 sps:$4 sm:$0xff]   ;;  %v3767_v19 = vld [vmem:[#allocation7 + $0x8] ss:$16 sps:$4 sm:$0xff]  }
  0xaa   : > { %1786 = vmatprep.subr.bf16.mxu0 %v3700_v21  ;;  %v290_v38 = vld [vmem:[%s4528_s27] sm:$0xff]  ;;  %v733_v11 = vld [vmem:[%s4520_s5 + $0x30] sm:$0xff]  ;;  %v3775_v21 = vld [vmem:[#allocation7 + $0x2c] ss:$16 sps:$4 sm:$0xff]  }
  0xab   : > { %v295_v40 = vsel %vm294_vm0, %v290_v38, 0.0  ;;  %v3728_v42 = vld [vmem:[#allocation7 + $0x144] ss:$16 sps:$4 sm:$0xff]   ;;  %v3732_v44 = vld [vmem:[#allocation7 + $0x140] ss:$16 sps:$4 sm:$0xff]  }
  0xac   : > { %1734 = vmatpush1.bf16.msra.mxu1 %v3702_v22  ;;  %v3730_v43 = vld [vmem:[#allocation7 + $0x344] ss:$16 sps:$4 sm:$0xff]   ;;  %296 = vadd.xlane.f32.xlu0 %v295_v40  ;;  %v3733_v45 = vld [vmem:[#allocation7 + $0x340] ss:$16 sps:$4 sm:$0xff]  }
  0xad   : > { %1787 = vmatpush1.bf16.msra.mxu0 %v3703_v23  ;;  %1735 = vmatprep.subr.bf16.mxu1 %v3704_v24  ;;  %v3734_v46 = vld [vmem:[#allocation7 + $0x164] ss:$16 sps:$4 sm:$0xff]   ;;  %v3738_v48 = vld [vmem:[#allocation7 + $0x160] ss:$16 sps:$4 sm:$0xff]   ;;  %v3773_v23 = vld [vmem:[#allocation7 + $0x28] ss:$16 sps:$4 sm:$0xff]  }
  0xae   : > { %1788 = vmatprep.subr.bf16.mxu0 %v3706_v25  ;;  %v3736_v47 = vld [vmem:[#allocation7 + $0x364] ss:$16 sps:$4 sm:$0xff]   ;;  %v3739_v49 = vld [vmem:[#allocation7 + $0x360] ss:$16 sps:$4 sm:$0xff]   ;;  %v3781_v25 = vld [vmem:[#allocation7 + $0x4c] ss:$16 sps:$4 sm:$0xff]  }
  0xaf   : > { %v3740_v52 = vld [vmem:[#allocation7 + $0x184] ss:$16 sps:$4 sm:$0xff]   ;;  %v3744_v59 = vld [vmem:[#allocation7 + $0x180] ss:$16 sps:$4 sm:$0xff]  }
  0xb0   : > { %1736 = vmatpush1.bf16.msra.mxu1 %v3708_v26  ;;  %v3742_v56 = vld [vmem:[#allocation7 + $0x384] ss:$16 sps:$4 sm:$0xff]   ;;  %v3745_v60 = vld [vmem:[#allocation7 + $0x380] ss:$16 sps:$4 sm:$0xff]   ;;  %299 = vadd.xlane.f32.xlu0 %v298_v61 }
  0xb1   : > { %1789 = vmatpush1.bf16.msra.mxu0 %v3709_v27  ;;  %1737 = vmatprep.subr.bf16.mxu1 %v3710_v28  ;;  %v3746_v62 = vld [vmem:[#allocation7 + $0x1a4] ss:$16 sps:$4 sm:$0xff]   ;;  %v3750_v0 = vld [vmem:[#allocation7 + $0x1a0] ss:$16 sps:$4 sm:$0xff]   ;;  %v3779_v27 = vld [vmem:[#allocation7 + $0x48] ss:$16 sps:$4 sm:$0xff]  }
  0xb2   : > { %1790 = vmatprep.subr.bf16.mxu0 %v3712_v29  ;;  %v3748_v63 = vld [vmem:[#allocation7 + $0x3a4] ss:$16 sps:$4 sm:$0xff]   ;;  %v3751_v1 = vld [vmem:[#allocation7 + $0x3a0] ss:$16 sps:$4 sm:$0xff]   ;;  %v3787_v29 = vld [vmem:[#allocation7 + $0x6c] ss:$16 sps:$4 sm:$0xff]  }
  0xb3   : > { %v3752_v2 = vld [vmem:[#allocation7 + $0x1c4] ss:$16 sps:$4 sm:$0xff]   ;;  %v3756_v4 = vld [vmem:[#allocation7 + $0x1c0] ss:$16 sps:$4 sm:$0xff]  }
  0xb4   : > { %1738 = vmatpush1.bf16.msra.mxu1 %v3714_v30  ;;  %v3754_v3 = vld [vmem:[#allocation7 + $0x3c4] ss:$16 sps:$4 sm:$0xff]   ;;  %v3757_v5 = vld [vmem:[#allocation7 + $0x3c0] ss:$16 sps:$4 sm:$0xff]  }
  0xb5   : > { %1791 = vmatpush1.bf16.msra.mxu0 %v3715_v31  ;;  %1739 = vmatprep.subr.bf16.mxu1 %v3716_v32  ;;  %v3758_v6 = vld [vmem:[#allocation7 + $0x1e4] ss:$16 sps:$4 sm:$0xff]   ;;  %v3762_v8 = vld [vmem:[#allocation7 + $0x1e0] ss:$16 sps:$4 sm:$0xff]   ;;  %v3785_v31 = vld [vmem:[#allocation7 + $0x68] ss:$16 sps:$4 sm:$0xff]  }
  0xb6   : > { %1792 = vmatprep.subr.bf16.mxu0 %v3718_v33  ;;  %v3760_v7 = vld [vmem:[#allocation7 + $0x3e4] ss:$16 sps:$4 sm:$0xff]   ;;  %v3763_v9 = vld [vmem:[#allocation7 + $0x3e0] ss:$16 sps:$4 sm:$0xff]   ;;  %v3793_v33 = vld [vmem:[#allocation7 + $0x8c] ss:$16 sps:$4 sm:$0xff]  }
  0xb7   : > { %v727_v10 = vld [vmem:[%s4520_s5] sm:$0xff]  ;;  %v729_v12 = vld [vmem:[%s4520_s5 + $0x10] sm:$0xff] }
  0xb8   : > { %1740 = vmatpush1.bf16.msra.mxu1 %v3720_v34  ;;  %v735_v13 = vld [vmem:[%s4520_s5 + $0x40] sm:$0xff]  ;;  %v4560_v16 = vpack.c.bf16 %v733_v11, %v727_v10  ;;  %v4567_v34 = vld [vmem:[%s4528_s27 + $0x10] sm:$0xff]  ;;  %v3821_v11 = vld [vmem:[#allocation7 + $0x128] ss:$16 sps:$4 sm:$0xff]  }
  0xb9   : > { %1793 = vmatpush1.bf16.msra.mxu0 %v3721_v35  ;;  %1741 = vmatprep.subr.bf16.mxu1 %v3722_v36  ;;  %v3766_v14 = vld [vmem:[#allocation7 + $0x404] ss:$16 sps:$4 sm:$0xff]   ;;  %v4562_v17 = vpack.c.bf16 %v735_v13, %v729_v12  ;;  %v3764_v18 = vld [vmem:[#allocation7 + $0x400] ss:$16 sps:$4 sm:$0xff]   ;;  %v301_v36 = vsel %vm294_vm0, %v4567_v34, 0.0 }
  0xba   : > { %1794 = vmatprep.subr.bf16.mxu0 %v3724_v37  ;;  %v3772_v20 = vld [vmem:[#allocation7 + $0x424] ss:$16 sps:$4 sm:$0xff]   ;;  %v3770_v22 = vld [vmem:[#allocation7 + $0x420] ss:$16 sps:$4 sm:$0xff]   ;;  %v3791_v37 = vld [vmem:[#allocation7 + $0x88] ss:$16 sps:$4 sm:$0xff]   ;;  %302 = vadd.xlane.f32.xlu1 %v301_v36 }
  0xbb   : > { %v3778_v24 = vld [vmem:[#allocation7 + $0x444] ss:$16 sps:$4 sm:$0xff]   ;;  %v3776_v26 = vld [vmem:[#allocation7 + $0x440] ss:$16 sps:$4 sm:$0xff]   ;;  %v3829_v13 = vld [vmem:[#allocation7 + $0x14c] ss:$16 sps:$4 sm:$0xff]  }
  0xbc   : > { %1742 = vmatpush1.bf16.msra.mxu1 %v3726_v39  ;;  %v3784_v28 = vld [vmem:[#allocation7 + $0x464] ss:$16 sps:$4 sm:$0xff]   ;;  %v3782_v30 = vld [vmem:[#allocation7 + $0x460] ss:$16 sps:$4 sm:$0xff]   ;;  %v3799_v39 = vld [vmem:[#allocation7 + $0xac] ss:$16 sps:$4 sm:$0xff]  }
  0xbd   : > { %1795 = vmatpush1.bf16.msra.mxu0 %v3727_v41  ;;  %1743 = vmatprep.subr.bf16.mxu1 %v3728_v42  ;;  %v3790_v32 = vld [vmem:[#allocation7 + $0x484] ss:$16 sps:$4 sm:$0xff]   ;;  %v3788_v35 = vld [vmem:[#allocation7 + $0x480] ss:$16 sps:$4 sm:$0xff]   ;;  %v3797_v41 = vld [vmem:[#allocation7 + $0xa8] ss:$16 sps:$4 sm:$0xff]  }
  0xbe   : > { %1796 = vmatprep.subr.bf16.mxu0 %v3730_v43  ;;  %v3796_v38 = vld [vmem:[#allocation7 + $0x4a4] ss:$16 sps:$4 sm:$0xff]   ;;  %v3794_v40 = vld [vmem:[#allocation7 + $0x4a0] ss:$16 sps:$4 sm:$0xff]   ;;  %v3805_v43 = vld [vmem:[#allocation7 + $0xcc] ss:$16 sps:$4 sm:$0xff]   ;;  %305 = vadd.xlane.f32.xlu1 %v304_v55 }
  0xbf   : > { %v3802_v42 = vld [vmem:[#allocation7 + $0x4c4] ss:$16 sps:$4 sm:$0xff]   ;;  %v3818_v10 = vld [vmem:[#allocation7 + $0x520] ss:$16 sps:$4 sm:$0xff]   ;;  %v3859_v36 = vld [vmem:[#allocation7 + $0x1ec] ss:$16 sps:$4 sm:$0xff]  }
  0xc0   : > { %1744 = vmatpush1.bf16.msra.mxu1 %v3732_v44  ;;  %v740_v44 = vld [vmem:[%s4520_s5 + $0x68] sm:$0xff]  ;;  %v747_v58 = vld [vmem:[%s4520_s5 + $0xa0] sm:$0xff]  ;;  %v749_v55 = vld [vmem:[%s4520_s5 + $0xb0] sm:$0xff] }
  0xc1   : > { %1797 = vmatpush1.bf16.msra.mxu0 %v3733_v45  ;;  %1745 = vmatprep.subr.bf16.mxu1 %v3734_v46  ;;  %v746_v45 = vld [vmem:[%s4520_s5 + $0x98] sm:$0xff]  ;;  %v739_v46 = vld [vmem:[%s4520_s5 + $0x60] sm:$0xff] }
  0xc2   : > { %1798 = vmatprep.subr.bf16.mxu0 %v3736_v47  ;;  %v745_v47 = vld [vmem:[%s4520_s5 + $0x90] sm:$0xff] }
  0xc3   : > { %v3826_v12 = vld [vmem:[#allocation7 + $0x544] ss:$16 sps:$4 sm:$0xff]  }
  0xc4   : > { %1746 = vmatpush1.bf16.msra.mxu1 %v3738_v48  ;;  %v4575_v48 = vpack.c.bf16 %v746_v45, %v740_v44  ;;  %v3860_v45 = vld [vmem:[#allocation7 + $0x208] ss:$16 sps:$4 sm:$0xff]  }
  0xc5   : > { %1799 = vmatpush1.bf16.msra.mxu0 %v3739_v49  ;;  %1747 = vmatprep.subr.bf16.mxu1 %v3740_v52  ;;  %v742_v49 = vld [vmem:[%s4520_s5 + $0x78] sm:$0xff]  ;;  %v4582_v52 = vpack.c.bf16 %v745_v47, %v739_v46 }
  0xc6   : > { %1800 = vmatprep.subr.bf16.mxu0 %v3742_v56  ;;  %v4584_v54 = vpack.c.bf16 %v748_v50, %v742_v49  ;;  %v741_v56 = vld [vmem:[%s4520_s5 + $0x70] sm:$0xff]  ;;  %v3865_v47 = vld [vmem:[#allocation7 + $0x22c] ss:$16 sps:$4 sm:$0xff]   ;;  %v3863_v49 = vld [vmem:[#allocation7 + $0x228] ss:$16 sps:$4 sm:$0xff]  }
  0xc7   : > { %v4591_v61 = vpack.c.bf16 %v747_v58, %v741_v56  ;;  %v743_v50 = vld [vmem:[%s4520_s5 + $0x80] sm:$0xff]  ;;  %v3868_v56 = vld [vmem:[#allocation7 + $0x24c] ss:$16 sps:$4 sm:$0xff]  }
  0xc8   : > { %1748 = vmatpush1.bf16.msra.mxu1 %v3744_v59  ;;  %v3800_v59 = vld [vmem:[#allocation7 + $0x4c0] ss:$16 sps:$4 sm:$0xff]   ;;  %v4616_v58 = vpack.c.bf16 %v749_v55, %v743_v50  ;;  %v3940_v55 = vld [vmem:[#allocation7 + $0x54c] ss:$16 sps:$4 sm:$0xff]  }
  0xc9   : > { %1801 = vmatpush1.bf16.msra.mxu0 %v3745_v60  ;;  %1749 = vmatprep.subr.bf16.mxu1 %v3746_v62  ;;  %v3803_v60 = vld [vmem:[#allocation7 + $0xc8] ss:$16 sps:$4 sm:$0xff]   ;;  %v3808_v62 = vld [vmem:[#allocation7 + $0x4e4] ss:$16 sps:$4 sm:$0xff]  }
  0xca   : > { %1802 = vmatprep.subr.bf16.mxu0 %v3748_v63  ;;  %v3811_v63 = vld [vmem:[#allocation7 + $0xec] ss:$16 sps:$4 sm:$0xff]  }
  0xcc   : > { %1750 = vmatpush1.bf16.msra.mxu1 %v3750_v0  ;;  %v3806_v0 = vld [vmem:[#allocation7 + $0x4e0] ss:$16 sps:$4 sm:$0xff]  }
  0xcd   : > { %1803 = vmatpush1.bf16.msra.mxu0 %v3751_v1  ;;  %1751 = vmatprep.subr.bf16.mxu1 %v3752_v2  ;;  %v3809_v1 = vld [vmem:[#allocation7 + $0xe8] ss:$16 sps:$4 sm:$0xff]   ;;  %v3814_v2 = vld [vmem:[#allocation7 + $0x504] ss:$16 sps:$4 sm:$0xff]  }
  0xce   : > { %1804 = vmatprep.subr.bf16.mxu0 %v3754_v3  ;;  %v732_v3 = vld [vmem:[%s4520_s5 + $0x28] sm:$0xff] }
  0xd0   : > { %1752 = vmatpush1.bf16.msra.mxu1 %v3756_v4  ;;  %v738_v4 = vld [vmem:[%s4520_s5 + $0x58] sm:$0xff] }
  0xd1   : > { %1805 = vmatpush1.bf16.msra.mxu0 %v3757_v5  ;;  %1753 = vmatprep.subr.bf16.mxu1 %v3758_v6  ;;  %v3817_v5 = vld [vmem:[#allocation7 + $0x10c] ss:$16 sps:$4 sm:$0xff]   ;;  %v4599_v6 = vpack.c.bf16 %v738_v4, %v732_v3  ;;  %v3881_v4 = vld [vmem:[#allocation7 + $0x2e8] ss:$16 sps:$4 sm:$0xff]  }
  0xd2   : > { %1806 = vmatprep.subr.bf16.mxu0 %v3760_v7  ;;  %v3812_v7 = vld [vmem:[#allocation7 + $0x500] ss:$16 sps:$4 sm:$0xff]   ;;  %v3883_v3 = vld [vmem:[#allocation7 + $0x2ec] ss:$16 sps:$4 sm:$0xff]  }
  0xd4   : > { %1754 = vmatpush1.bf16.msra.mxu1 %v3762_v8  ;;  %v3815_v8 = vld [vmem:[#allocation7 + $0x108] ss:$16 sps:$4 sm:$0xff]  }
  0xd5   : > { %1807 = vmatpush1.bf16.msra.mxu0 %v3763_v9  ;;  %1882 = vmatprep.subr.bf16.mxu1 %v3769_v15  ;;  %v3820_v9 = vld [vmem:[#allocation7 + $0x524] ss:$16 sps:$4 sm:$0xff]   ;;  %v3827_v15 = vld [vmem:[#allocation7 + $0x148] ss:$16 sps:$4 sm:$0xff]  }
  0xd6   : > { %1829 = vmatprep.subr.bf16.mxu0 %v3766_v14  ;;  %v3824_v14 = vld [vmem:[#allocation7 + $0x540] ss:$16 sps:$4 sm:$0xff]  }
  0xd7   : > { %1756 = vmatmul.mubr.bf16.vlgmr.msra.gmra.mrb[0].mxu1 %v4560_v16 }
  0xd8   : > { %1809 = vmatmul.mubr.bf16.vlgmr.msra.gmra.mrb[0].mxu0 %v4562_v17  ;;  %1883 = vmatpush1.bf16.msra.mxu1 %v3767_v19  ;;  %v3835_v19 = vld [vmem:[#allocation7 + $0x16c] ss:$16 sps:$4 sm:$0xff]  }
  0xd9   : > { %1830 = vmatpush1.bf16.msra.mxu0 %v3764_v18  ;;  %1884 = vmatprep.subr.bf16.mxu1 %v3775_v21  ;;  %v3832_v18 = vld [vmem:[#allocation7 + $0x564] ss:$16 sps:$4 sm:$0xff]   ;;  %v3833_v21 = vld [vmem:[#allocation7 + $0x168] ss:$16 sps:$4 sm:$0xff]  }
  0xda   : > { %1831 = vmatprep.subr.bf16.mxu0 %v3772_v20  ;;  %1765 = vmatprep.mubr.bf16.mxu1 %v4575_v48  ;;  %v3830_v20 = vld [vmem:[#allocation7 + $0x560] ss:$16 sps:$4 sm:$0xff]  }
  0xdb   : > { %1818 = vmatprep.mubr.bf16.mxu0 %v4584_v54 }
  0xdc   : > { %1885 = vmatpush1.bf16.msra.mxu1 %v3773_v23  ;;  %v3841_v23 = vld [vmem:[#allocation7 + $0x18c] ss:$16 sps:$4 sm:$0xff]  }
  0xdd   : > { %1832 = vmatpush1.bf16.msra.mxu0 %v3770_v22  ;;  %1886 = vmatprep.subr.bf16.mxu1 %v3781_v25  ;;  %v3838_v22 = vld [vmem:[#allocation7 + $0x584] ss:$16 sps:$4 sm:$0xff]   ;;  %v3839_v25 = vld [vmem:[#allocation7 + $0x188] ss:$16 sps:$4 sm:$0xff]  }
  0xde   : > { %1833 = vmatprep.subr.bf16.mxu0 %v3778_v24  ;;  %v3836_v24 = vld [vmem:[#allocation7 + $0x580] ss:$16 sps:$4 sm:$0xff]  }
  0xdf   : > { %1766 = vmatmul.mubr.bf16.gmra.mrb[4].mxu1 %v4582_v52 }
  0xe0   : > { %1887 = vmatpush1.bf16.msra.mxu1 %v3779_v27  ;;  %1819 = vmatmul.mubr.bf16.gmra.mrb[4].mxu0 %v4591_v61  ;;  %v3847_v27 = vld [vmem:[#allocation7 + $0x1ac] ss:$16 sps:$4 sm:$0xff]  }
  0xe1   : > { %1834 = vmatpush1.bf16.msra.mxu0 %v3776_v26  ;;  %1888 = vmatprep.subr.bf16.mxu1 %v3787_v29  ;;  %v3844_v26 = vld [vmem:[#allocation7 + $0x5a4] ss:$16 sps:$4 sm:$0xff]   ;;  %v3845_v29 = vld [vmem:[#allocation7 + $0x1a8] ss:$16 sps:$4 sm:$0xff]  }
  0xe2   : > { %1835 = vmatprep.subr.bf16.mxu0 %v3784_v28  ;;  %1914 = vmatprep.mubr.bf16.mxu1 %v4546_v53  ;;  %v3823_v53 = vld [vmem:[#allocation7 + $0x12c] ss:$16 sps:$4 sm:$0xff]   ;;  %v3842_v28 = vld [vmem:[#allocation7 + $0x5a0] ss:$16 sps:$4 sm:$0xff]  }
  0xe3   : > { %1861 = vmatprep.mubr.bf16.mxu0 %v4599_v6 }
  0xe4   : > { %1889 = vmatpush1.bf16.msra.mxu1 %v3785_v31  ;;  %v3853_v31 = vld [vmem:[#allocation7 + $0x1cc] ss:$16 sps:$4 sm:$0xff]  }
  0xe5   : > { %1836 = vmatpush1.bf16.msra.mxu0 %v3782_v30  ;;  %1890 = vmatprep.subr.bf16.mxu1 %v3793_v33  ;;  %v3850_v30 = vld [vmem:[#allocation7 + $0x5c4] ss:$16 sps:$4 sm:$0xff]   ;;  %v3851_v33 = vld [vmem:[#allocation7 + $0x1c8] ss:$16 sps:$4 sm:$0xff]  }
  0xe6   : > { %1837 = vmatprep.subr.bf16.mxu0 %v3790_v32  ;;  %v3848_v32 = vld [vmem:[#allocation7 + $0x5c0] ss:$16 sps:$4 sm:$0xff]  }
  0xe8   : > { %1891 = vmatpush1.bf16.msra.mxu1 %v3791_v37  ;;  %v3854_v37 = vld [vmem:[#allocation7 + $0x5e0] ss:$16 sps:$4 sm:$0xff]  }
  0xe9   : > { %1838 = vmatpush1.bf16.msra.mxu0 %v3788_v35  ;;  %1892 = vmatprep.subr.bf16.mxu1 %v3799_v39  ;;  %v3856_v35 = vld [vmem:[#allocation7 + $0x5e4] ss:$16 sps:$4 sm:$0xff]  }
  0xea   : > { %1839 = vmatprep.subr.bf16.mxu0 %v3796_v38  ;;  %v3857_v38 = vld [vmem:[#allocation7 + $0x1e8] ss:$16 sps:$4 sm:$0xff]   ;;  %v731_v39 = vld [vmem:[%s4520_s5 + $0x20] sm:$0xff] }
  0xec   : > { %1893 = vmatpush1.bf16.msra.mxu1 %v3797_v41  ;;  %v3862_v41 = vld [vmem:[#allocation7 + $0x20c] ss:$16 sps:$4 sm:$0xff]  }
  0xed   : > { %1840 = vmatpush1.bf16.msra.mxu0 %v3794_v40  ;;  %1894 = vmatprep.subr.bf16.mxu1 %v3805_v43  ;;  %v737_v40 = vld [vmem:[%s4520_s5 + $0x50] sm:$0xff]  ;;  %v750_v43 = vld [vmem:[%s4520_s5 + $0xb8] sm:$0xff] }
  0xee   : > { %1841 = vmatprep.subr.bf16.mxu0 %v3802_v42  ;;  %v744_v42 = vld [vmem:[%s4520_s5 + $0x88] sm:$0xff]  ;;  %v4606_v44 = vpack.c.bf16 %v737_v40, %v731_v39 }
  0xef   : > { %v4608_v46 = vpack.c.bf16 %v750_v43, %v744_v42  ;;  %v3931_v39 = vld [vmem:[#allocation7 + $0x4ec] ss:$16 sps:$4 sm:$0xff]   ;;  %v3929_v40 = vld [vmem:[#allocation7 + $0x4e8] ss:$16 sps:$4 sm:$0xff]   ;;  %v4268_v42 = vmov 0  }
  0xf0   : > { %1895 = vmatpush1.bf16.msra.mxu1 %v3803_v60  ;;  %v3871_v60 = vld [vmem:[#allocation7 + $0x26c] ss:$16 sps:$4 sm:$0xff]   ;;  %v3932_v43 = vld [vmem:[#allocation7 + $0x508] ss:$16 sps:$4 sm:$0xff]  }
  0xf1   : > { %1842 = vmatpush1.bf16.msra.mxu0 %v3800_v59  ;;  %1896 = vmatprep.subr.bf16.mxu1 %v3811_v63  ;;  %v3866_v59 = vld [vmem:[#allocation7 + $0x248] ss:$16 sps:$4 sm:$0xff]  }
  0xf2   : > { %1843 = vmatprep.subr.bf16.mxu0 %v3808_v62  ;;  %v3869_v62 = vld [vmem:[#allocation7 + $0x268] ss:$16 sps:$4 sm:$0xff]  }
  0xf3   : > { %v3872_v63 = vld [vmem:[#allocation7 + $0x288] ss:$16 sps:$4 sm:$0xff]  }
  0xf4   : > { %1897 = vmatpush1.bf16.msra.mxu1 %v3809_v1  ;;  %v3880_v1 = vld [vmem:[#allocation7 + $0x2cc] ss:$16 sps:$4 sm:$0xff]  }
  0xf5   : > { %1844 = vmatpush1.bf16.msra.mxu0 %v3806_v0  ;;  %1898 = vmatprep.subr.bf16.mxu1 %v3817_v5  ;;  %v3877_v0 = vld [vmem:[#allocation7 + $0x2ac] ss:$16 sps:$4 sm:$0xff]  }
  0xf6   : > { %1845 = vmatprep.subr.bf16.mxu0 %v3814_v2  ;;  %v3878_v2 = vld [vmem:[#allocation7 + $0x2c8] ss:$16 sps:$4 sm:$0xff]   ;;  %v3886_v5 = vld [vmem:[#allocation7 + $0x30c] ss:$16 sps:$4 sm:$0xff]  }
  0xf8   : > { %1899 = vmatpush1.bf16.msra.mxu1 %v3815_v8  ;;  %v3892_v8 = vld [vmem:[#allocation7 + $0x34c] ss:$16 sps:$4 sm:$0xff]  }
  0xf9   : > { %1846 = vmatpush1.bf16.msra.mxu0 %v3812_v7  ;;  %1900 = vmatprep.subr.bf16.mxu1 %v3823_v53  ;;  %v3887_v7 = vld [vmem:[#allocation7 + $0x328] ss:$16 sps:$4 sm:$0xff]   ;;  %v3895_v53 = vld [vmem:[#allocation7 + $0x36c] ss:$16 sps:$4 sm:$0xff]  }
  0xfa   : > { %1847 = vmatprep.subr.bf16.mxu0 %v3820_v9  ;;  %v3890_v9 = vld [vmem:[#allocation7 + $0x348] ss:$16 sps:$4 sm:$0xff]  }
  0xfc   : > { %1901 = vmatpush1.bf16.msra.mxu1 %v3821_v11  ;;  %v3898_v11 = vld [vmem:[#allocation7 + $0x38c] ss:$16 sps:$4 sm:$0xff]  }
  0xfd   : > { %1848 = vmatpush1.bf16.msra.mxu0 %v3818_v10  ;;  %1902 = vmatprep.subr.bf16.mxu1 %v3829_v13  ;;  %v3893_v10 = vld [vmem:[#allocation7 + $0x368] ss:$16 sps:$4 sm:$0xff]   ;;  %v3901_v13 = vld [vmem:[#allocation7 + $0x3ac] ss:$16 sps:$4 sm:$0xff]  }
  0xfe   : > { %1849 = vmatprep.subr.bf16.mxu0 %v3826_v12  ;;  %v3896_v12 = vld [vmem:[#allocation7 + $0x388] ss:$16 sps:$4 sm:$0xff]  }
 0x100   : > { %1903 = vmatpush1.bf16.msra.mxu1 %v3827_v15  ;;  %v3899_v15 = vld [vmem:[#allocation7 + $0x3a8] ss:$16 sps:$4 sm:$0xff]  }
 0x101   : > { %1850 = vmatpush1.bf16.msra.mxu0 %v3824_v14  ;;  %1904 = vmatprep.subr.bf16.mxu1 %v3835_v19  ;;  %v3904_v19 = vld [vmem:[#allocation7 + $0x3cc] ss:$16 sps:$4 sm:$0xff]  }
 0x102   : > { %1851 = vmatprep.subr.bf16.mxu0 %v3832_v18 }
 0x104   : > { %1905 = vmatpush1.bf16.msra.mxu1 %v3833_v21  ;;  %v3907_v21 = vld [vmem:[#allocation7 + $0x3ec] ss:$16 sps:$4 sm:$0xff]  }
 0x105   : > { %1852 = vmatpush1.bf16.msra.mxu0 %v3830_v20  ;;  %1906 = vmatprep.subr.bf16.mxu1 %v3841_v23  ;;  %v3902_v20 = vld [vmem:[#allocation7 + $0x3c8] ss:$16 sps:$4 sm:$0xff]   ;;  %v3910_v23 = vld [vmem:[#allocation7 + $0x40c] ss:$16 sps:$4 sm:$0xff]  }
 0x106   : > { %1853 = vmatprep.subr.bf16.mxu0 %v3838_v22  ;;  %v3905_v22 = vld [vmem:[#allocation7 + $0x3e8] ss:$16 sps:$4 sm:$0xff]  }
 0x108   : > { %1907 = vmatpush1.bf16.msra.mxu1 %v3839_v25 }
 0x109   : > { %1854 = vmatpush1.bf16.msra.mxu0 %v3836_v24  ;;  %1908 = vmatprep.subr.bf16.mxu1 %v3847_v27 }
 0x10a   : > { %1855 = vmatprep.subr.bf16.mxu0 %v3844_v26  ;;  %v3908_v26 = vld [vmem:[#allocation7 + $0x408] ss:$16 sps:$4 sm:$0xff]  }
 0x10c   : > { %1909 = vmatpush1.bf16.msra.mxu1 %v3845_v29  ;;  %v3911_v29 = vld [vmem:[#allocation7 + $0x428] ss:$16 sps:$4 sm:$0xff]  }
 0x10d   : > { %1856 = vmatpush1.bf16.msra.mxu0 %v3842_v28  ;;  %1910 = vmatprep.subr.bf16.mxu1 %v3853_v31  ;;  %v3913_v28 = vld [vmem:[#allocation7 + $0x42c] ss:$16 sps:$4 sm:$0xff]   ;;  %v3914_v31 = vld [vmem:[#allocation7 + $0x448] ss:$16 sps:$4 sm:$0xff]  }
 0x10e   : > { %1857 = vmatprep.subr.bf16.mxu0 %v3850_v30  ;;  %v3916_v30 = vld [vmem:[#allocation7 + $0x44c] ss:$16 sps:$4 sm:$0xff]  }
 0x110   : > { %1911 = vmatpush1.bf16.msra.mxu1 %v3851_v33 }
 0x111   : > { %1858 = vmatpush1.bf16.msra.mxu0 %v3848_v32  ;;  %1912 = vmatprep.subr.bf16.mxu1 %v3859_v36  ;;  %v3919_v32 = vld [vmem:[#allocation7 + $0x46c] ss:$16 sps:$4 sm:$0xff]  }
 0x112   : > { %1859 = vmatprep.subr.bf16.mxu0 %v3856_v35  ;;  %v3917_v35 = vld [vmem:[#allocation7 + $0x468] ss:$16 sps:$4 sm:$0xff]   ;;  %v3925_v36 = vld [vmem:[#allocation7 + $0x4ac] ss:$16 sps:$4 sm:$0xff]  }
 0x114   : > { %1913 = vmatpush1.bf16.msra.mxu1 %v3857_v38  ;;  %v3928_v38 = vld [vmem:[#allocation7 + $0x4cc] ss:$16 sps:$4 sm:$0xff]  }
 0x115   : > { %1860 = vmatpush1.bf16.msra.mxu0 %v3854_v37  ;;  %1935 = vmatprep.subr.bf16.mxu1 %v3862_v41  ;;  %v3923_v37 = vld [vmem:[#allocation7 + $0x4a8] ss:$16 sps:$4 sm:$0xff]  }
 0x117   : > { %1915 = vmatmul.mubr.bf16.vlgmr.msra.gmra.mrb[8].mxu1 %v4560_v16  ;;  %v3874_v16 = vld [vmem:[#allocation7 + $0x28c] ss:$16 sps:$4 sm:$0xff]  }
 0x118   : > { %1862 = vmatmul.mubr.bf16.vlgmr.msra.gmra.mrb[0].mxu0 %v4606_v44  ;;  %1936 = vmatpush1.bf16.msra.mxu1 %v3860_v45 }
 0x119   : > { %1871 = vmatprep.mubr.bf16.mxu0 %v4608_v46  ;;  %1937 = vmatprep.subr.bf16.mxu1 %v3865_v47  ;;  %v3937_v47 = vld [vmem:[#allocation7 + $0x52c] ss:$16 sps:$4 sm:$0xff]  }
 0x11a   : > { %1924 = vmatprep.mubr.bf16.mxu1 %v4575_v48  ;;  %v3875_v48 = vld [vmem:[#allocation7 + $0x2a8] ss:$16 sps:$4 sm:$0xff]  }
 0x11c   : > { %1938 = vmatpush1.bf16.msra.mxu1 %v3863_v49  ;;  %v3935_v49 = vld [vmem:[#allocation7 + $0x528] ss:$16 sps:$4 sm:$0xff]  }
 0x11d   : > { %1939 = vmatprep.subr.bf16.mxu1 %v3868_v56 }
 0x11f   : > { %1925 = vmatmul.mubr.bf16.gmra.mrb[12].mxu1 %v4582_v52  ;;  %v3884_v52 = vld [vmem:[#allocation7 + $0x308] ss:$16 sps:$4 sm:$0xff]  }
 0x120   : > { %1872 = vmatmul.mubr.bf16.gmra.mrb[4].mxu0 %v4616_v58  ;;  %1940 = vmatpush1.bf16.msra.mxu1 %v3866_v59  ;;  %v3938_v59 = vld [vmem:[#allocation7 + $0x548] ss:$16 sps:$4 sm:$0xff]  }
 0x121   : > { %1967 = vmatprep.mubr.bf16.mxu1 %v4550_v57  ;;  %1941 = vmatprep.subr.bf16.mxu1 %v3871_v60  ;;  %v3889_v57 = vld [vmem:[#allocation7 + $0x32c] ss:$16 sps:$4 sm:$0xff]  }
 0x122   : > { %2105 = vmatprep.mubr.bf16.mxu0 %v4268_v42  ;;  %v3943_v60 = vld [vmem:[#allocation7 + $0x56c] ss:$16 sps:$4 sm:$0xff]  }
 0x124   : > { %1942 = vmatpush1.bf16.msra.mxu1 %v3869_v62 }
 0x125   : > { %1943 = vmatprep.subr.bf16.mxu1 %v3874_v16  ;;  %v3941_v16 = vld [vmem:[#allocation7 + $0x568] ss:$16 sps:$4 sm:$0xff]  }
 0x128   : > { %1944 = vmatpush1.bf16.msra.mxu1 %v3872_v63  ;;  %v3946_v63 = vld [vmem:[#allocation7 + $0x58c] ss:$16 sps:$4 sm:$0xff]  }
 0x129   : > { %1945 = vmatprep.subr.bf16.mxu1 %v3877_v0  ;;  %v3944_v0 = vld [vmem:[#allocation7 + $0x588] ss:$16 sps:$4 sm:$0xff]  }
 0x12c   : > { %1946 = vmatpush1.bf16.msra.mxu1 %v3875_v48 }
 0x12d   : > { %1947 = vmatprep.subr.bf16.mxu1 %v3880_v1  ;;  %v3949_v1 = vld [vmem:[#allocation7 + $0x5ac] ss:$16 sps:$4 sm:$0xff]  }
 0x130   : > { %1948 = vmatpush1.bf16.msra.mxu1 %v3878_v2  ;;  %v3947_v2 = vld [vmem:[#allocation7 + $0x5a8] ss:$16 sps:$4 sm:$0xff]  }
 0x131   : > { %1949 = vmatprep.subr.bf16.mxu1 %v3883_v3  ;;  %v3952_v3 = vld [vmem:[#allocation7 + $0x5cc] ss:$16 sps:$4 sm:$0xff]  }
 0x134   : > { %1950 = vmatpush1.bf16.msra.mxu1 %v3881_v4  ;;  %v3950_v4 = vld [vmem:[#allocation7 + $0x5c8] ss:$16 sps:$4 sm:$0xff]  }
 0x135   : > { %1951 = vmatprep.subr.bf16.mxu1 %v3886_v5  ;;  %v3955_v5 = vld [vmem:[#allocation7 + $0x5ec] ss:$16 sps:$4 sm:$0xff]  }
 0x138   : > { %1952 = vmatpush1.bf16.msra.mxu1 %v3884_v52  ;;  %v3953_v52 = vld [vmem:[#allocation7 + $0x5e8] ss:$16 sps:$4 sm:$0xff]  }
 0x139   : > { %1953 = vmatprep.subr.bf16.mxu1 %v3889_v57  ;;  %v297_v14 = vpop.xlane.xlu0 %296 }
 0x13a   : > { %v307_v18 = vmax.f32 %v297_v14, 1.0 }
 0x13c   : > { %1954 = vmatpush1.bf16.msra.mxu1 %v3887_v7  ;;  %4052 = vrsqrt.f32 %v307_v18  ;;  %v4060_v18 = vld [vmem:[%s4528_s27 + $0x8] sm:$0xff] }
 0x13d   : > { %1955 = vmatprep.subr.bf16.mxu1 %v3892_v8  ;;  %v300_v24 = vpop.xlane.xlu0 %299 }
 0x13e   : > { %v308_v27 = vmax.f32 %v300_v24, 1.0 }
 0x140   : > { %1956 = vmatpush1.bf16.msra.mxu1 %v3890_v9  ;;  %4054 = vrsqrt.f32 %v308_v27 }
 0x141   : > { %1957 = vmatprep.subr.bf16.mxu1 %v3895_v53 }
 0x144   : > { %1958 = vmatpush1.bf16.msra.mxu1 %v3893_v10 }
 0x145   : > { %1959 = vmatprep.subr.bf16.mxu1 %v3898_v11 }
 0x146   : > { %v4621_v25 = vpop.eup %4052 }
 0x147   : > { %319 = vxpose.xlu0.b32.start.end [1/1] (short) (narrow) %v4621_v25, 8  ;;  %v303_v41 = vpop.xlane.xlu1 %302 }
 0x148   : > { %1960 = vmatpush1.bf16.msra.mxu1 %v3896_v12  ;;  %v309_v45 = vmax.f32 %v303_v41, 1.0 }
 0x149   : > { %1961 = vmatprep.subr.bf16.mxu1 %v3901_v13  ;;  %v447_v13 = vlaneseq }
 0x14a   : > { %v4627_v33 = vpop.eup %4054  ;;  %4056 = vrsqrt.f32 %v309_v45 }
 0x14b   : > { %351 = vxpose.xlu1.b32.start.end [1/1] (short) (narrow) %v4627_v33, 8  ;;  %v306_v50 = vpop.xlane.xlu1 %305  ;;  %v448_v14 = vshrl.u32 %v447_v13, 7 }
 0x14c   : > { %1962 = vmatpush1.bf16.msra.mxu1 %v3899_v15  ;;  %v310_v56 = vmax.f32 %v306_v50, 1.0 }
 0x14d   : > { %1963 = vmatprep.subr.bf16.mxu1 %v3904_v19  ;;  %v449_v15 = vsub.s32 0, %v448_v14 }
 0x14e   : > { %4058 = vrsqrt.f32 %v310_v56 }
 0x150   : > { %1964 = vmatpush1.bf16.msra.mxu1 %v3902_v20 }
 0x151   : > { %1965 = vmatprep.subr.bf16.mxu1 %v3907_v21  ;;  %v4061_v21 = vld [vmem:[%s4528_s27] sm:$0xff] }
 0x154   : > { %1966 = vmatpush1.bf16.msra.mxu1 %v3905_v22  ;;  %v4632_v62 = vpop.eup %4056  ;;  %v315_v22 = vmul.f32 %v4061_v21, %v4621_v25 }
 0x155   : > { %1988 = vmatprep.subr.bf16.mxu1 %v3910_v23  ;;  %383 = vxpose.xlu0.b32.start.end [1/1] (short) (narrow) %v4632_v62, 8 }
 0x157   : > { %1968 = vmatmul.mubr.bf16.vlgmr.msra.gmra.mrb[8].mxu1 %v4562_v17  ;;  %v3922_v17 = vld [vmem:[#allocation7 + $0x48c] ss:$16 sps:$4 sm:$0xff]  }
 0x158   : > { %1989 = vmatpush1.bf16.msra.mxu1 %v3908_v26  ;;  %1977 = vmatprep.mubr.bf16.mxu1 %v4584_v54  ;;  %v3920_v54 = vld [vmem:[#allocation7 + $0x488] ss:$16 sps:$4 sm:$0xff]   ;;  %v4635_v48 = vpop.eup %4058 }
 0x159   : > { %1990 = vmatprep.subr.bf16.mxu1 %v3913_v28  ;;  %415 = vxpose.xlu0.b32.start.end [1/1] (short) (narrow) %v4635_v48, 8  ;;  %v318_v50 = vmul.f32 %v4635_v48, %v4580_v51 }
 0x15c   : > { %1991 = vmatpush1.bf16.msra.mxu1 %v3911_v29 }
 0x15d   : > { %1992 = vmatprep.subr.bf16.mxu1 %v3916_v30 }
 0x15f   : > { %1978 = vmatmul.mubr.bf16.gmra.mrb[12].mxu1 %v4591_v61  ;;  %v3926_v61 = vld [vmem:[#allocation7 + $0x4c8] ss:$16 sps:$4 sm:$0xff]  }
 0x160   : > { %1993 = vmatpush1.bf16.msra.mxu1 %v3914_v31  ;;  %2020 = vmatprep.mubr.bf16.mxu1 %v4599_v6  ;;  %v3934_v6 = vld [vmem:[#allocation7 + $0x50c] ss:$16 sps:$4 sm:$0xff]  }
 0x161   : > { %1994 = vmatprep.subr.bf16.mxu1 %v3919_v32 }
 0x164   : > { %1995 = vmatpush1.bf16.msra.mxu1 %v3917_v35 }
 0x165   : > { %1996 = vmatprep.subr.bf16.mxu1 %v3922_v17 }
 0x168   : > { %1997 = vmatpush1.bf16.msra.mxu1 %v3920_v54 }
 0x169   : > { %1998 = vmatprep.subr.bf16.mxu1 %v3925_v36 }
 0x16c   : > { %1999 = vmatpush1.bf16.msra.mxu1 %v3923_v37 }
 0x16d   : > { %2000 = vmatprep.subr.bf16.mxu1 %v3928_v38 }
 0x170   : > { %2001 = vmatpush1.bf16.msra.mxu1 %v3926_v61 }
 0x171   : > { %2002 = vmatprep.subr.bf16.mxu1 %v3931_v39 }
 0x174   : > { %2003 = vmatpush1.bf16.msra.mxu1 %v3929_v40 }
 0x175   : > { %2004 = vmatprep.subr.bf16.mxu1 %v3934_v6 }
 0x178   : > { %2005 = vmatpush1.bf16.msra.mxu1 %v3932_v43  ;;  %v317_v43 = vmul.f32 %v4632_v62, %v4567_v34 }
 0x179   : > { %2006 = vmatprep.subr.bf16.mxu1 %v3937_v47 }
 0x17c   : > { %2007 = vmatpush1.bf16.msra.mxu1 %v3935_v49 }
 0x17d   : > { %2008 = vmatprep.subr.bf16.mxu1 %v3940_v55 }
 0x180   : > { %2009 = vmatpush1.bf16.msra.mxu1 %v3938_v59 }
 0x181   : > { %2010 = vmatprep.subr.bf16.mxu1 %v3943_v60 }
 0x184   : > { %2011 = vmatpush1.bf16.msra.mxu1 %v3941_v16 }
 0x185   : > { %2012 = vmatprep.subr.bf16.mxu1 %v3946_v63 }
 0x188   : > { %2013 = vmatpush1.bf16.msra.mxu1 %v3944_v0 }
 0x189   : > { %2014 = vmatprep.subr.bf16.mxu1 %v3949_v1 }
 0x18c   : > { %2015 = vmatpush1.bf16.msra.mxu1 %v3947_v2 }
 0x18d   : > { %2016 = vmatprep.subr.bf16.mxu1 %v3952_v3 }
 0x190   : > { %2017 = vmatpush1.bf16.msra.mxu1 %v3950_v4 }
 0x191   : > { %2018 = vmatprep.subr.bf16.mxu1 %v3955_v5 }
 0x194   : > { %2019 = vmatpush1.bf16.msra.mxu1 %v3953_v52 }
 0x197   : > { %2021 = vmatmul.mubr.bf16.vlgmr.msra.gmra.mrb[8].mxu1 %v4606_v44  ;;  %v316_v44 = vmul.f32 %v4060_v18, %v4627_v33 }
 0x198   : > { %2030 = vmatprep.mubr.bf16.mxu1 %v4608_v46 }
 0x19f   : > { %2031 = vmatmul.mubr.bf16.gmra.mrb[12].mxu1 %v4616_v58 }
 0x1a0   : > { %2243 = vmatprep.mubr.bf16.mxu1 %v4268_v42 }
 0x1aa   : > { %v1757_v57 = vpop.f32.mrb[0].mxu1 }
 0x1ab   : > { %v1759_v7 = vpop.f32.mrb[1].mxu1 }
 0x1ac   : > { %v1761_v8 = vpop.f32.mrb[2].mxu1 }
 0x1ad   : > { %v1763_v9 = vpop.f32.mrb[3].mxu1 }
 0x1b2   : > { %v1767_v53 = vpop.f32.mrb[4].mxu1 }
 0x1b3   : > { %v1769_v10 = vpop.f32.mrb[5].mxu1 }
 0x1b4   : > { %v1771_v11 = vpop.f32.mrb[6].mxu1 }
 0x1b5   : > { %v1773_v12 = vpop.f32.mrb[7].mxu1 }
 0x1c7   : > { %v335_v20 = vpop.trf.xlu0 }
 0x1c8   : > { %v450_v23 = vrot.slane %v335_v20, %v449_v15  ;;  %v3958_v20 = vld [vmem:[#allocation8 + $0x4] ss:$8 sps:$4 sm:$0xff]  }
 0x1ca   : > { %v463_v35 = vmul.f32 %v450_v23, %v315_v22  ;;  %v3956_v23 = vld [vmem:[#allocation8] ss:$8 sps:$4 sm:$0xff]  }
 0x1cb   : > { %v367_v46 = vpop.trf.xlu1 }
 0x1cc   : > { %v454_v19 = vrot.slane %v367_v46, %v449_v15  ;;  %v4648_v36 = vpack.c.bf16 %v463_v35, %v463_v35  ;;  %v3973_v35 = vld [vmem:[#allocation8 + $0x54] ss:$8 sps:$4 sm:$0xff]  }
 0x1ce   : > { %v464_v58 = vmul.f32 %v454_v19, %v316_v44 }
 0x1d0   : > { %v4665_v48 = vpack.c.bf16 %v464_v58, %v464_v58 }
 0x1d5   : > { %v399_v45 = vpop.trf.xlu0 }
 0x1d6   : > { %v458_v47 = vrot.slane %v399_v45, %v449_v15  ;;  %v3989_v45 = vld [vmem:[#allocation8 + $0xb0] ss:$8 sps:$4 sm:$0xff]  }
 0x1d8   : > { %v465_v49 = vmul.f32 %v458_v47, %v317_v43  ;;  %v3991_v43 = vld [vmem:[#allocation8 + $0xb4] ss:$8 sps:$4 sm:$0xff]   ;;  %v3994_v47 = vld [vmem:[#allocation8 + $0xc4] ss:$8 sps:$4 sm:$0xff]  }
 0x1d9   : > { %v431_v55 = vpop.trf.xlu0 }
 0x1da   : > { %v462_v56 = vrot.slane %v431_v55, %v449_v15  ;;  %v4678_v46 = vpack.c.bf16 %v465_v49, %v465_v49  ;;  %v3992_v49 = vld [vmem:[#allocation8 + $0xc0] ss:$8 sps:$4 sm:$0xff]  }
 0x1dc   : > { %v466_v59 = vmul.f32 %v462_v56, %v318_v50  ;;  %v3997_v50 = vld [vmem:[#allocation8 + $0xd4] ss:$8 sps:$4 sm:$0xff]   ;;  %v3995_v56 = vld [vmem:[#allocation8 + $0xd0] ss:$8 sps:$4 sm:$0xff]  }
 0x1de   : > { %v4691_v22 = vpack.c.bf16 %v466_v59, %v466_v59 }
 0x1eb   : > { %v1863_v24 = vpop.f32.mrb[0].mxu0 }
 0x1ec   : > { %v3543_v26 = vadd.f32 %v1863_v24, %v1757_v57  ;;  %v1865_v27 = vpop.f32.mrb[1].mxu0  ;;  %v3961_v24 = vld [vmem:[#allocation8 + $0x14] ss:$8 sps:$4 sm:$0xff]  }
 0x1ed   : > { %v3544_v28 = vadd.f32 %v1865_v27, %v1759_v7  ;;  %v1867_v29 = vpop.f32.mrb[2].mxu0  ;;  %v3964_v27 = vld [vmem:[#allocation8 + $0x24] ss:$8 sps:$4 sm:$0xff]  }
 0x1ee   : > { %v2041_v30 = vpack.c.bf16 %v3543_v26, %v3543_v26  ;;  %v3545_v31 = vadd.f32 %v1867_v29, %v1761_v8  ;;  %v1869_v32 = vpop.f32.mrb[3].mxu0  ;;  %v3959_v26 = vld [vmem:[#allocation8 + $0x10] ss:$8 sps:$4 sm:$0xff]   ;;  %v3967_v29 = vld [vmem:[#allocation8 + $0x34] ss:$8 sps:$4 sm:$0xff]  }
 0x1ef   : > { %v2042_v17 = vpack.c.bf16 %v3544_v28, %v3544_v28  ;;  %v3546_v33 = vadd.f32 %v1869_v32, %v1763_v9  ;;  %v3962_v28 = vld [vmem:[#allocation8 + $0x20] ss:$8 sps:$4 sm:$0xff]  }
 0x1f0   : > { %v2062_v54 = vsel %vm2060_vm1, %v2041_v30, 0  ;;  %v2045_v5 = vpack.c.bf16 %v3545_v31, %v3545_v31  ;;  %v3965_v30 = vld [vmem:[#allocation8 + $0x30] ss:$8 sps:$4 sm:$0xff]   ;;  %v3970_v31 = vld [vmem:[#allocation8 + $0x44] ss:$8 sps:$4 sm:$0xff]  }
 0x1f1   : > { %3446 = vmatprep.subr.msk.bf16.mxu0 %vm2060_vm1, %v2042_v17  ;;  %v2046_v34 = vpack.c.bf16 %v3546_v33, %v3546_v33  ;;  %v3968_v32 = vld [vmem:[#allocation8 + $0x40] ss:$8 sps:$4 sm:$0xff]   ;;  %v3971_v17 = vld [vmem:[#allocation8 + $0x50] ss:$8 sps:$4 sm:$0xff]   ;;  %v3976_v33 = vld [vmem:[#allocation8 + $0x64] ss:$8 sps:$4 sm:$0xff]  }
 0x1f2   : > { %2074 = vmatpush1.bf16.msra.mxu0 %v2062_v54  ;;  %v2159_v51 = vsel %vm2060_vm1, %v2045_v5, 0  ;;  %v3974_v54 = vld [vmem:[#allocation8 + $0x60] ss:$8 sps:$4 sm:$0xff]  }
 0x1f3   : > { %v1873_v25 = vpop.f32.mrb[4].mxu0 }
 0x1f4   : > { %v3547_v37 = vadd.f32 %v1873_v25, %v1767_v53  ;;  %v1875_v38 = vpop.f32.mrb[5].mxu0  ;;  %v3979_v25 = vld [vmem:[#allocation8 + $0x74] ss:$8 sps:$4 sm:$0xff]  }
 0x1f5   : > { %v3548_v61 = vadd.f32 %v1875_v38, %v1769_v10  ;;  %v1877_v39 = vpop.f32.mrb[6].mxu0  ;;  %3447 = vmatmul.mubr.msk.bf16.vlgmr.msra.gmra.mrb[8].mxu0 %vm294_vm0, %v4648_v36  ;;  %v3982_v38 = vld [vmem:[#allocation8 + $0x84] ss:$8 sps:$4 sm:$0xff]  }
 0x1f6   : > { %v4652_v40 = vadd.f32 %v1877_v39, %v1771_v11  ;;  %v1879_v6 = vpop.f32.mrb[7].mxu0  ;;  %2146 = vmatprep.mubr.bf16.mxu0 %v4268_v42  ;;  %v2049_v13 = vpack.c.bf16 %v3547_v37, %v3547_v37  ;;  %v3977_v37 = vld [vmem:[#allocation8 + $0x70] ss:$8 sps:$4 sm:$0xff]   ;;  %v3985_v39 = vld [vmem:[#allocation8 + $0x94] ss:$8 sps:$4 sm:$0xff]  }
 0x1f7   : > { %v3550_v41 = vadd.f32 %v1879_v6, %v1773_v12  ;;  %v2050_v57 = vpack.c.bf16 %v3548_v61, %v3548_v61  ;;  %v3980_v61 = vld [vmem:[#allocation8 + $0x80] ss:$8 sps:$4 sm:$0xff]   ;;  %v3988_v6 = vld [vmem:[#allocation8 + $0xa4] ss:$8 sps:$4 sm:$0xff]  }
 0x1f8   : > { %v2256_v18 = vsel %vm2060_vm1, %v2049_v13, 0  ;;  %v2053_v58 = vpack.c.bf16 %v4652_v40, %v4652_v40  ;;  %v3983_v40 = vld [vmem:[#allocation8 + $0x90] ss:$8 sps:$4 sm:$0xff]  }
 0x1f9   : > { %v2054_v44 = vpack.c.bf16 %v3550_v41, %v3550_v41  ;;  %v3986_v41 = vld [vmem:[#allocation8 + $0xa0] ss:$8 sps:$4 sm:$0xff]  }
 0x1fa   : > { %v2353_v21 = vsel %vm2060_vm1, %v2053_v58, 0 }
 0x26a   : > { %v2022_v60 = vpop.f32.mrb[8].mxu1 }
 0x26b   : > { %v2043_v16 = vpack.c.bf16 %v2022_v60, %v2022_v60  ;;  %v2024_v63 = vpop.f32.mrb[9].mxu1 }
 0x26c   : > { %v2044_v0 = vpack.c.bf16 %v2024_v63, %v2024_v63  ;;  %v2026_v1 = vpop.f32.mrb[10].mxu1  ;;  %v4000_v63 = vld [vmem:[#allocation8 + $0xe4] ss:$8 sps:$4 sm:$0xff]  }
 0x26d   : > { %v2068_v2 = vsel %vm2060_vm1, %v2043_v16, 0  ;;  %v2047_v3 = vpack.c.bf16 %v2026_v1, %v2026_v1  ;;  %v2028_v4 = vpop.f32.mrb[11].mxu1  ;;  %v4003_v1 = vld [vmem:[#allocation8 + $0xf4] ss:$8 sps:$4 sm:$0xff]  }
 0x26e   : > { %v2048_v62 = vpack.c.bf16 %v2028_v4, %v2028_v4  ;;  %3448 = vmatprep.subr.msk.bf16.mxu0 %vm2060_vm1, %v2044_v0  ;;  %v3998_v0 = vld [vmem:[#allocation8 + $0xe0] ss:$8 sps:$4 sm:$0xff]  }
 0x26f   : > { %v2165_v52 = vsel %vm2060_vm1, %v2047_v3, 0  ;;  %2115 = vmatpush1.bf16.msra.mxu0 %v2068_v2  ;;  %v4001_v2 = vld [vmem:[#allocation8 + $0xf0] ss:$8 sps:$4 sm:$0xff]   ;;  %v4006_v3 = vld [vmem:[#allocation8 + $0x104] ss:$8 sps:$4 sm:$0xff]  }
 0x270   : > { %3450 = vmatprep.subr.msk.bf16.mxu0 %vm2060_vm1, %v2046_v34  ;;  %3452 = vmatprep.subr.msk.bf16.mxu1 %vm2060_vm1, %v2048_v62 }
 0x271   : > { %2212 = vmatpush1.bf16.msra.mxu1 %v2165_v52 }
 0x272   : > { %v2032_v7 = vpop.f32.mrb[12].mxu1  ;;  %3449 = vmatmul.mubr.msk.bf16.vlgmr.msra.gmra.mrb[12].mxu0 %vm294_vm0, %v4648_v36 }
 0x273   : > { %v2051_v8 = vpack.c.bf16 %v2032_v7, %v2032_v7  ;;  %v2034_v9 = vpop.f32.mrb[13].mxu1  ;;  %2171 = vmatpush1.bf16.msra.mxu0 %v2159_v51  ;;  %2202 = vmatprep.mubr.bf16.mxu0 %v4268_v42 }
 0x274   : > { %v2052_v53 = vpack.c.bf16 %v2034_v9, %v2034_v9  ;;  %v2036_v10 = vpop.f32.mrb[14].mxu1  ;;  %3453 = vmatmul.mubr.msk.bf16.vlgmr.msra.gmra.mrb[16].mxu1 %vm294_vm0, %v4665_v48  ;;  %3454 = vmatprep.subr.msk.bf16.mxu0 %vm2060_vm1, %v2050_v57 }
 0x275   : > { %v2262_v11 = vsel %vm2060_vm1, %v2051_v8, 0  ;;  %v2038_v12 = vpop.f32.mrb[15].mxu1  ;;  %2340 = vmatprep.mubr.bf16.mxu1 %v4268_v42  ;;  %v2055_v15 = vpack.c.bf16 %v2036_v10, %v2036_v10 }
 0x276   : > { %v2056_v14 = vpack.c.bf16 %v2038_v12, %v2038_v12  ;;  %3456 = vmatprep.subr.msk.bf16.mxu1 %vm2060_vm1, %v2052_v53 }
 0x277   : > { %2309 = vmatpush1.bf16.msra.mxu1 %v2262_v11  ;;  %v2359_v19 = vsel %vm2060_vm1, %v2055_v15, 0 }
 0x278   : > { %3460 = vmatprep.subr.msk.bf16.mxu1 %vm2060_vm1, %v2056_v14 }
 0x27a   : > { %3451 = vmatmul.mubr.msk.bf16.vlgmr.msra.gmra.mrb[16].mxu0 %vm294_vm0, %v4665_v48 }
 0x27b   : > { %2268 = vmatpush1.bf16.msra.mxu0 %v2256_v18  ;;  %2299 = vmatprep.mubr.bf16.mxu0 %v4268_v42 }
 0x27c   : > { %3458 = vmatprep.subr.msk.bf16.mxu0 %vm2060_vm1, %v2054_v44  ;;  %3457 = vmatmul.mubr.msk.bf16.vlgmr.msra.gmra.mrb[20].mxu1 %vm294_vm0, %v4678_v46 }
 0x27d   : > { %2406 = vmatpush1.bf16.msra.mxu1 %v2359_v19  ;;  %2437 = vmatprep.mubr.bf16.mxu1 %v4268_v42 }
 0x282   : > { %3455 = vmatmul.mubr.msk.bf16.vlgmr.msra.gmra.mrb[20].mxu0 %vm294_vm0, %v4678_v46 }
 0x283   : > { %2365 = vmatpush1.bf16.msra.mxu0 %v2353_v21  ;;  %2396 = vmatprep.mubr.bf16.mxu0 %v4268_v42 }
 0x284   : > { %3461 = vmatmul.mubr.msk.bf16.vlgmr.msra.gmra.mrb[24].mxu1 %vm294_vm0, %v4691_v22  ;;  %2790 = vmatprep.subr.bf16.mxu0 %v3958_v20 }
 0x285   : > { %2942 = vmatprep.mubr.bf16.mxu1 %v4268_v42 }
 0x28a   : > { %3459 = vmatmul.mubr.msk.bf16.vlgmr.msra.gmra.mrb[24].mxu0 %vm294_vm0, %v4691_v22 }
 0x28b   : > { %2791 = vmatpush1.bf16.msra.mxu0 %v3956_v23 }
 0x28c   : > { %2792 = vmatprep.subr.bf16.mxu0 %v3961_v24 }
 0x28f   : > { %2793 = vmatpush1.bf16.msra.mxu0 %v3959_v26 }
 0x290   : > { %2794 = vmatprep.subr.bf16.mxu0 %v3964_v27 }
 0x293   : > { %2795 = vmatpush1.bf16.msra.mxu0 %v3962_v28  ;;  %v4004_v28 = vld [vmem:[#allocation8 + $0x100] ss:$8 sps:$4 sm:$0xff]  }
 0x294   : > { %2796 = vmatprep.subr.bf16.mxu0 %v3967_v29 }
 0x297   : > { %2797 = vmatpush1.bf16.msra.mxu0 %v3965_v30  ;;  %v4009_v30 = vld [vmem:[#allocation8 + $0x114] ss:$8 sps:$4 sm:$0xff]  }
 0x298   : > { %2798 = vmatprep.subr.bf16.mxu0 %v3970_v31 }
 0x29b   : > { %2799 = vmatpush1.bf16.msra.mxu0 %v3968_v32  ;;  %v4007_v32 = vld [vmem:[#allocation8 + $0x110] ss:$8 sps:$4 sm:$0xff]  }
 0x29c   : > { %2800 = vmatprep.subr.bf16.mxu0 %v3973_v35 }
 0x29f   : > { %2801 = vmatpush1.bf16.msra.mxu0 %v3971_v17  ;;  %v4012_v17 = vld [vmem:[#allocation8 + $0x124] ss:$8 sps:$4 sm:$0xff]  }
 0x2a0   : > { %2802 = vmatprep.subr.bf16.mxu0 %v3976_v33 }
 0x2a3   : > { %2803 = vmatpush1.bf16.msra.mxu0 %v3974_v54 }
 0x2a4   : > { %2804 = vmatprep.subr.bf16.mxu0 %v3979_v25 }
 0x2a7   : > { %2805 = vmatpush1.bf16.msra.mxu0 %v3977_v37 }
 0x2a8   : > { %2806 = vmatprep.subr.bf16.mxu0 %v3982_v38 }
 0x2ab   : > { %2807 = vmatpush1.bf16.msra.mxu0 %v3980_v61 }
 0x2ac   : > { %2808 = vmatprep.subr.bf16.mxu0 %v3985_v39 }
 0x2af   : > { %2809 = vmatpush1.bf16.msra.mxu0 %v3983_v40 }
 0x2b0   : > { %2810 = vmatprep.subr.bf16.mxu0 %v3988_v6 }
 0x2b3   : > { %2811 = vmatpush1.bf16.msra.mxu0 %v3986_v41  ;;  %v4010_v41 = vld [vmem:[#allocation8 + $0x120] ss:$8 sps:$4 sm:$0xff]  }
 0x2b4   : > { %2812 = vmatprep.subr.bf16.mxu0 %v3991_v43 }
 0x2b7   : > { %2813 = vmatpush1.bf16.msra.mxu0 %v3989_v45 }
 0x2b8   : > { %2814 = vmatprep.subr.bf16.mxu0 %v3994_v47  ;;  %v4015_v47 = vld [vmem:[#allocation8 + $0x134] ss:$8 sps:$4 sm:$0xff]  }
 0x2bb   : > { %2815 = vmatpush1.bf16.msra.mxu0 %v3992_v49 }
 0x2bc   : > { %2816 = vmatprep.subr.bf16.mxu0 %v3997_v50 }
 0x2bf   : > { %2817 = vmatpush1.bf16.msra.mxu0 %v3995_v56 }
 0x2c0   : > { %2818 = vmatprep.subr.bf16.mxu0 %v4000_v63 }
 0x2c3   : > { %2819 = vmatpush1.bf16.msra.mxu0 %v3998_v0 }
 0x2c4   : > { %2820 = vmatprep.subr.bf16.mxu0 %v4003_v1 }
 0x2c7   : > { %2821 = vmatpush1.bf16.msra.mxu0 %v4001_v2 }
 0x2c8   : > { %v2107_v55 = vpop.f32.mrb[8].mxu0  ;;  %2843 = vmatprep.subr.bf16.mxu0 %v4006_v3 }
 0x2c9   : > { %v2109_v59 = vpop.f32.mrb[9].mxu0  ;;  %v2446_v14 = vmax.f32 %v2107_v55, 0.0  ;;  %v4013_v55 = vld [vmem:[#allocation8 + $0x130] ss:$8 sps:$4 sm:$0xff]  }
 0x2ca   : > { %v2111_v60 = vpop.f32.mrb[10].mxu0  ;;  %v2447_v44 = vmax.f32 %v2109_v59, 0.0 }
 0x2cb   : > { %v2112_v16 = vpop.f32.mrb[11].mxu0 }
 0x2cc   : > { %v4018_v16 = vld [vmem:[#allocation8 + $0x144] ss:$8 sps:$4 sm:$0xff]  }
 0x345   : > { %v2148_v4 = vpop.f32.mrb[12].mxu0 }
 0x346   : > { %v2150_v5 = vpop.f32.mrb[13].mxu0  ;;  %v2448_v52 = vmax.f32 %v2148_v4, 0.0 }
 0x347   : > { %v2152_v34 = vpop.f32.mrb[14].mxu0  ;;  %v2245_v62 = vpop.f32.mrb[16].mxu1  ;;  %v2449_v8 = vmax.f32 %v2150_v5, 0.0  ;;  %v4016_v5 = vld [vmem:[#allocation8 + $0x140] ss:$8 sps:$4 sm:$0xff]  }
 0x348   : > { %v2452_v51 = vmax.f32 %v2245_v62, 0.0  ;;  %v2153_v57 = vpop.f32.mrb[15].mxu0  ;;  %v2247_v7 = vpop.f32.mrb[17].mxu1  ;;  %v4021_v34 = vld [vmem:[#allocation8 + $0x154] ss:$8 sps:$4 sm:$0xff]  }
 0x349   : > { %v2453_v9 = vmax.f32 %v2247_v7, 0.0  ;;  %v2249_v53 = vpop.f32.mrb[18].mxu1  ;;  %v4019_v62 = vld [vmem:[#allocation8 + $0x150] ss:$8 sps:$4 sm:$0xff]   ;;  %v4027_v57 = vld [vmem:[#allocation8 + $0x174] ss:$8 sps:$4 sm:$0xff]  }
 0x34a   : > { %v4701_v10 = vpack.c.bf16 %v2452_v51, %v2448_v52  ;;  %v2250_v11 = vpop.f32.mrb[19].mxu1  ;;  %v4024_v52 = vld [vmem:[#allocation8 + $0x164] ss:$8 sps:$4 sm:$0xff]   ;;  %v4022_v51 = vld [vmem:[#allocation8 + $0x160] ss:$8 sps:$4 sm:$0xff]  }
 0x34b   : > { %v2465_v12 = vpack.c.bf16 %v2453_v9, %v2449_v8  ;;  %v4025_v7 = vld [vmem:[#allocation8 + $0x170] ss:$8 sps:$4 sm:$0xff]   ;;  %v4030_v8 = vld [vmem:[#allocation8 + $0x184] ss:$8 sps:$4 sm:$0xff]   ;;  %v4028_v9 = vld [vmem:[#allocation8 + $0x180] ss:$8 sps:$4 sm:$0xff]  }
 0x34c   : > { %v4033_v53 = vld [vmem:[#allocation8 + $0x194] ss:$8 sps:$4 sm:$0xff]   ;;  %v4031_v11 = vld [vmem:[#allocation8 + $0x190] ss:$8 sps:$4 sm:$0xff]  }
 0x34d   : > { %v2204_v13 = vpop.f32.mrb[16].mxu0 }
 0x34e   : > { %v2450_v15 = vmax.f32 %v2204_v13, 0.0  ;;  %v2206_v18 = vpop.f32.mrb[17].mxu0  ;;  %v4036_v13 = vld [vmem:[#allocation8 + $0x1a4] ss:$8 sps:$4 sm:$0xff]  }
 0x34f   : > { %v2451_v19 = vmax.f32 %v2206_v18, 0.0  ;;  %v2208_v58 = vpop.f32.mrb[18].mxu0  ;;  %v2342_v20 = vpop.f32.mrb[20].mxu1  ;;  %v4042_v18 = vld [vmem:[#allocation8 + $0x1c4] ss:$8 sps:$4 sm:$0xff]  }
 0x350   : > { %v2462_v21 = vpack.c.bf16 %v2450_v15, %v2446_v14  ;;  %v2209_v23 = vpop.f32.mrb[19].mxu0  ;;  %v2344_v24 = vpop.f32.mrb[21].mxu1  ;;  %v2456_v25 = vmax.f32 %v2342_v20, 0.0  ;;  %v4039_v14 = vld [vmem:[#allocation8 + $0x1b4] ss:$8 sps:$4 sm:$0xff]  }
 0x351   : > { %v2463_v26 = vpack.c.bf16 %v2451_v19, %v2447_v44  ;;  %v2346_v27 = vpop.f32.mrb[22].mxu1  ;;  %v2457_v39 = vmax.f32 %v2344_v24, 0.0  ;;  %v4037_v15 = vld [vmem:[#allocation8 + $0x1b0] ss:$8 sps:$4 sm:$0xff]   ;;  %v4040_v44 = vld [vmem:[#allocation8 + $0x1c0] ss:$8 sps:$4 sm:$0xff]  }
 0x352   : > { %v2347_v29 = vpop.f32.mrb[23].mxu1  ;;  %v4045_v19 = vld [vmem:[#allocation8 + $0x1d4] ss:$8 sps:$4 sm:$0xff]   ;;  %v4043_v58 = vld [vmem:[#allocation8 + $0x1d0] ss:$8 sps:$4 sm:$0xff]  }
 0x353   : > { %2822 = vmatprep.mubr.bf16.mxu0 %v2463_v26  ;;  %v4048_v20 = vld [vmem:[#allocation8 + $0x1e4] ss:$8 sps:$4 sm:$0xff]   ;;  %v4051_v23 = vld [vmem:[#allocation8 + $0x1f4] ss:$8 sps:$4 sm:$0xff]   ;;  %v4049_v24 = vld [vmem:[#allocation8 + $0x1f0] ss:$8 sps:$4 sm:$0xff]  }
 0x354   : > { %2823 = vmatmul.mubr.bf16.vlgmr.msra.gmra.mrb[28].mxu0 %v2462_v21  ;;  %v4046_v21 = vld [vmem:[#allocation8 + $0x1e0] ss:$8 sps:$4 sm:$0xff]  }
 0x355   : > { %2844 = vmatpush1.bf16.msra.mxu0 %v4004_v28  ;;  %v2301_v31 = vpop.f32.mrb[20].mxu0 }
 0x356   : > { %v2303_v35 = vpop.f32.mrb[21].mxu0  ;;  %2845 = vmatprep.subr.bf16.mxu0 %v4009_v30  ;;  %v2454_v56 = vmax.f32 %v2301_v31, 0.0 }
 0x357   : > { %v2305_v33 = vpop.f32.mrb[22].mxu0  ;;  %v2439_v54 = vpop.f32.mrb[24].mxu1  ;;  %v2455_v63 = vmax.f32 %v2303_v35, 0.0 }
 0x358   : > { %v2460_v37 = vmax.f32 %v2439_v54, 0.0  ;;  %v2306_v38 = vpop.f32.mrb[23].mxu0  ;;  %v2441_v61 = vpop.f32.mrb[25].mxu1 }
 0x359   : > { %v2461_v40 = vmax.f32 %v2441_v61, 0.0  ;;  %2846 = vmatpush1.bf16.msra.mxu0 %v4007_v32  ;;  %v2443_v6 = vpop.f32.mrb[26].mxu1 }
 0x35a   : > { %v4703_v43 = vpack.c.bf16 %v2460_v37, %v2456_v25  ;;  %v2444_v45 = vpop.f32.mrb[27].mxu1  ;;  %2847 = vmatprep.subr.bf16.mxu0 %v4012_v17 }
 0x35b   : > { %v4705_v49 = vpack.c.bf16 %v2461_v40, %v2457_v39 }
 0x35d   : > { %2848 = vmatpush1.bf16.msra.mxu0 %v4010_v41  ;;  %v2398_v50 = vpop.f32.mrb[24].mxu0 }
 0x35e   : > { %v2458_v59 = vmax.f32 %v2398_v50, 0.0  ;;  %v2400_v60 = vpop.f32.mrb[25].mxu0  ;;  %2849 = vmatprep.subr.bf16.mxu0 %v4015_v47 }
 0x35f   : > { %v2459_v0 = vmax.f32 %v2400_v60, 0.0  ;;  %v2402_v1 = vpop.f32.mrb[26].mxu0 }
 0x360   : > { %v2466_v2 = vpack.c.bf16 %v2458_v59, %v2454_v56  ;;  %v2403_v3 = vpop.f32.mrb[27].mxu0 }
 0x361   : > { %v2467_v4 = vpack.c.bf16 %v2459_v0, %v2455_v63  ;;  %2850 = vmatpush1.bf16.msra.mxu0 %v4013_v55 }
 0x362   : > { %2851 = vmatprep.subr.bf16.mxu0 %v4018_v16 }
 0x363   : > { %2832 = vmatprep.mubr.bf16.mxu0 %v2467_v4 }
 0x364   : > { %2833 = vmatmul.mubr.bf16.gmra.mrb[32].mxu0 %v2466_v2 }
 0x365   : > { %2852 = vmatpush1.bf16.msra.mxu0 %v4016_v5  ;;  %2875 = vmatprep.mubr.bf16.mxu0 %v2465_v12  ;;  %v4034_v12 = vld [vmem:[#allocation8 + $0x1a0] ss:$8 sps:$4 sm:$0xff]  }
 0x366   : > { %2853 = vmatprep.subr.bf16.mxu0 %v4021_v34 }
 0x369   : > { %2854 = vmatpush1.bf16.msra.mxu0 %v4019_v62 }
 0x36a   : > { %2855 = vmatprep.subr.bf16.mxu0 %v4024_v52 }
 0x36d   : > { %2856 = vmatpush1.bf16.msra.mxu0 %v4022_v51 }
 0x36e   : > { %2857 = vmatprep.subr.bf16.mxu0 %v4027_v57 }
 0x371   : > { %2858 = vmatpush1.bf16.msra.mxu0 %v4025_v7 }
 0x372   : > { %2859 = vmatprep.subr.bf16.mxu0 %v4030_v8 }
 0x375   : > { %2860 = vmatpush1.bf16.msra.mxu0 %v4028_v9 }
 0x376   : > { %2861 = vmatprep.subr.bf16.mxu0 %v4033_v53 }
 0x379   : > { %2862 = vmatpush1.bf16.msra.mxu0 %v4031_v11 }
 0x37a   : > { %2863 = vmatprep.subr.bf16.mxu0 %v4036_v13 }
 0x37d   : > { %2864 = vmatpush1.bf16.msra.mxu0 %v4034_v12 }
 0x37e   : > { %2865 = vmatprep.subr.bf16.mxu0 %v4039_v14 }
 0x381   : > { %2866 = vmatpush1.bf16.msra.mxu0 %v4037_v15 }
 0x382   : > { %2867 = vmatprep.subr.bf16.mxu0 %v4042_v18 }
 0x385   : > { %2868 = vmatpush1.bf16.msra.mxu0 %v4040_v44 }
 0x386   : > { %2869 = vmatprep.subr.bf16.mxu0 %v4045_v19 }
 0x389   : > { %2870 = vmatpush1.bf16.msra.mxu0 %v4043_v58 }
 0x38a   : > { %2871 = vmatprep.subr.bf16.mxu0 %v4048_v20 }
 0x38d   : > { %2872 = vmatpush1.bf16.msra.mxu0 %v4046_v21 }
 0x38e   : > { %2873 = vmatprep.subr.bf16.mxu0 %v4051_v23 }
 0x391   : > { %2874 = vmatpush1.bf16.msra.mxu0 %v4049_v24 }
 0x394   : > { %2876 = vmatmul.mubr.bf16.vlgmr.msra.gmra.mrb[28].mxu0 %v4701_v10 }
 0x395   : > { %2885 = vmatprep.mubr.bf16.mxu0 %v4705_v49 }
 0x39c   : > { %2886 = vmatmul.mubr.bf16.gmra.mrb[32].mxu0 %v4703_v43 }
 0x467   : > { %v2877_v26 = vpop.f32.mrb[28].mxu0 }
 0x468   : > { %v2896_v27 = vpack.c.bf16 %v2877_v26, %v2877_v26  ;;  %v2879_v28 = vpop.f32.mrb[29].mxu0 }
 0x469   : > { %v2897_v29 = vpack.c.bf16 %v2879_v28, %v2879_v28  ;;  %v2881_v30 = vpop.f32.mrb[30].mxu0 }
 0x46a   : > { %v2905_v31 = vsel %vm2060_vm1, %v2896_v27, 0  ;;  %v2883_v32 = vpop.f32.mrb[31].mxu0  ;;  %v2898_v35 = vpack.c.bf16 %v2881_v30, %v2881_v30 }
 0x46b   : > { %v2899_v17 = vpack.c.bf16 %v2883_v32, %v2883_v32  ;;  %3526 = vmatprep.subr.msk.bf16.mxu1 %vm2060_vm1, %v2897_v29 }
 0x46c   : > { %2911 = vmatpush1.bf16.msra.mxu1 %v2905_v31  ;;  %v2952_v10 = vsel %vm2060_vm1, %v2898_v35, 0 }
 0x46d   : > { %3528 = vmatprep.subr.msk.bf16.mxu1 %vm2060_vm1, %v2899_v17 }
 0x46f   : > { %v2887_v33 = vpop.f32.mrb[32].mxu0  ;;  %3527 = vmatmul.mubr.msk.bf16.vlgmr.msra.gmra.mrb[28].mxu1 %vm294_vm0, %v4648_v36 }
 0x470   : > { %v2889_v54 = vpop.f32.mrb[33].mxu0  ;;  %2958 = vmatpush1.bf16.msra.mxu1 %v2952_v10  ;;  %2989 = vmatprep.mubr.bf16.mxu1 %v4268_v42  ;;  %v2900_v61 = vpack.c.bf16 %v2887_v33, %v2887_v33 }
 0x471   : > { %v2901_v25 = vpack.c.bf16 %v2889_v54, %v2889_v54  ;;  %v2891_v37 = vpop.f32.mrb[34].mxu0 }
 0x472   : > { %v2893_v38 = vpop.f32.mrb[35].mxu0  ;;  %v2999_v39 = vsel %vm2060_vm1, %v2900_v61, 0  ;;  %v2902_v36 = vpack.c.bf16 %v2891_v37, %v2891_v37 }
 0x473   : > { %3530 = vmatprep.subr.msk.bf16.mxu1 %vm2060_vm1, %v2901_v25  ;;  %v2903_v40 = vpack.c.bf16 %v2893_v38, %v2893_v38 }
 0x474   : > { %v3046_v6 = vsel %vm2060_vm1, %v2902_v36, 0 }
 0x477   : > { %3529 = vmatmul.mubr.msk.bf16.vlgmr.msra.gmra.mrb[32].mxu1 %vm294_vm0, %v4665_v48 }
 0x478   : > { %3005 = vmatpush1.bf16.msra.mxu1 %v2999_v39  ;;  %3036 = vmatprep.mubr.bf16.mxu1 %v4268_v42 }
 0x479   : > { %3532 = vmatprep.subr.msk.bf16.mxu1 %vm2060_vm1, %v2903_v40 }
 0x47f   : > { %3531 = vmatmul.mubr.msk.bf16.vlgmr.msra.gmra.mrb[36].mxu1 %vm294_vm0, %v4678_v46 }
 0x480   : > { %3052 = vmatpush1.bf16.msra.mxu1 %v3046_v6  ;;  %3083 = vmatprep.mubr.bf16.mxu1 %v4268_v42 }
 0x487   : > { %3533 = vmatmul.mubr.msk.bf16.vlgmr.msra.gmra.mrb[40].mxu1 %vm294_vm0, %v4691_v22 }
 0x542   : > { %v2944_v41 = vpop.f32.mrb[28].mxu1 }
 0x543   : > { %v3092_v48 = vmax.f32 %v2944_v41, 0.0  ;;  %v2946_v43 = vpop.f32.mrb[29].mxu1 }
 0x544   : > { %v3093_v45 = vmax.f32 %v2946_v43, 0.0  ;;  %v2948_v47 = vpop.f32.mrb[30].mxu1 }
 0x545   : > { %3100 = vst [vmem:[%s4730_s13] sm:$0xff] %v3092_v48  ;;  %v2949_v46 = vpop.f32.mrb[31].mxu1 }
 0x546   : > { %3101 = vst [vmem:[%s4730_s13 + $0x8] sm:$0xff] %v3093_v45 }
 0x54a   : > { %v2991_v42 = vpop.f32.mrb[32].mxu1 }
 0x54b   : > { %v3094_v22 = vmax.f32 %v2991_v42, 0.0  ;;  %v2993_v49 = vpop.f32.mrb[33].mxu1 }
 0x54c   : > { %v3095_v50 = vmax.f32 %v2993_v49, 0.0  ;;  %v2995_v55 = vpop.f32.mrb[34].mxu1 }
 0x54d   : > { %3102 = vst [vmem:[%s4730_s13 + $0x10] sm:$0xff] %v3094_v22  ;;  %v2996_v56 = vpop.f32.mrb[35].mxu1 }
 0x54e   : > { %3103 = vst [vmem:[%s4730_s13 + $0x18] sm:$0xff] %v3095_v50 }
 0x552   : > { %v3038_v59 = vpop.f32.mrb[36].mxu1 }
 0x553   : > { %v3096_v60 = vmax.f32 %v3038_v59, 0.0  ;;  %v3040_v16 = vpop.f32.mrb[37].mxu1 }
 0x554   : > { %v3097_v63 = vmax.f32 %v3040_v16, 0.0  ;;  %v3042_v0 = vpop.f32.mrb[38].mxu1 }
 0x555   : > { %3104 = vst [vmem:[%s4730_s13 + $0x20] sm:$0xff] %v3096_v60  ;;  %v3043_v1 = vpop.f32.mrb[39].mxu1 }
 0x556   : > { %3105 = vst [vmem:[%s4730_s13 + $0x28] sm:$0xff] %v3097_v63 }
 0x55a   : > { %v3085_v2 = vpop.f32.mrb[40].mxu1 }
 0x55b   : > { %v3098_v3 = vmax.f32 %v3085_v2, 0.0  ;;  %v3087_v4 = vpop.f32.mrb[41].mxu1 }
 0x55c   : > { %v3099_v5 = vmax.f32 %v3087_v4, 0.0  ;;  %v3089_v34 = vpop.f32.mrb[42].mxu1 }
 0x55d   : > { %3106 = vst [vmem:[%s4730_s13 + $0x30] sm:$0xff] %v3098_v3  ;;  %v3090_v62 = vpop.f32.mrb[43].mxu1 }
 0x55e   : > { %3107 = vst [vmem:[%s4730_s13 + $0x38] sm:$0xff] %v3099_v5 }
 0x55f   : > { %4191 = shalt.err (!%p4188_p5)
}
 0x560   : > { %s4192_s7 = scalar_lea.hbm %s4745_s24, 1024  ;;  %s4196_s0 = scalar_lea.hbm %s4795_s4, 2048 }
 0x561   : > { %p4193_p9 = scmp.ne.s32.totalorder %s4745_s24, %s4192_s7  ;;  %p4197_p11 = scmp.lt.u32.totalorder %s4745_s24, %s4795_s4 }
 0x562   : > { %p4198_p1 = scmp.lt.u32.totalorder %s4196_s0, %s4192_s7  ;;  %p4200_p2 = scmp.lt.u32.totalorder %s4192_s7, %s4745_s24 }
 0x563   : > { %p4194_p0 = pnand %p4193_p9, %p4819_p13 }
 0x564   : > { %p4199_p12 = por %p4198_p1, %p4197_p11 }
 0x565   : > { %p4195_p8 = pneg %p4194_p0 }
 0x566   : > { %p4201_p6 = por %p4200_p2, %p4199_p12 }
 0x568   : > { %p4202_p10 = pnand %p4201_p6, %p4195_p8 }
 0x56a   : > { %4205 = shalt.err (!%p4202_p10)
}
 0x56b   : > { %s4270_s27 = smov 256   ;;  %s4271_s21 = smov 16  }
 0x56c   : > { %3598 = dma.vmem_to_hbm [thread:$0]  (%p4819_p13), %s4740_s25, 1024, %s4745_s24, %s3109_s29, %s4270_s27, %s4270_s27, %s4271_s21  }
 0x56d PF: > { %s3138_s13 = sand.u32 1, %s4244_s15   ;;  %p4820_p4 = scmp.ne.s32.totalorder %s4804_s22, 0 }
 0x56e   : > { %p4821_p7 = scmp.ge.s32.totalorder %s4256_s18, 2  ;;  %s3139_s10 = scalar_lea.sflag [#allocation4], %s3138_s13 }
 0x570   : > { %p3615_p3 = pnand %p4821_p7, %p4820_p4 }
 0x572   : > { %4239 = dma.done.wait (!%p3615_p3), %s3139_s10, 1024  }
 0x573   : > { %4241 = vsyncadd (!%p3615_p3), %s3139_s10, 4294966272  ;;  %p21_p5 = scmp.ge.s32.totalorder %s4410_s11, 4   ;;  %s4822_s15 = smov %s4248_s16 }
 0x574   : > { %s4823_s16 = smov %s4252_s17  ;;  %s4824_s17 = smov %s4419_s14 }
 0x575   : > { %s4825_s18 = smov %s4410_s11  ;;  %23 = sbr.rel (!%p21_p5) target bundleno = 11 (0xb), region = 102 }
 0x57c   :  { %3144 = vsyncpa [#allocation3], 1 }
 0x57d   :  { %3146 = vsyncpa [#allocation3 + $0x1], 1 }
 0x57e   :  { %3147 = vsyncpa [#allocation6], 1 }
 0x57f   :  { %3149 = vsyncpa [#allocation6 + $0x1], 1 }
 0x580   :  { %3150 = vsyncpa [#allocation9], 1 }
 0x581   :  { %3151 = vsyncpa [#allocation4], 1 }
 0x582   :  { %3153 = vsyncpa [#allocation4 + $0x1], 1 }

</bundles_post_ra>
